<compile_context>
chip_gen: v7x
topology: tpu7x:2x2x1
jax: 0.10.0
libtpu: 0.0.40
codegen_flags: <defaults>
</compile_context>

<pallas_src>
import functools

import numpy as np

import jax
import jax.numpy as jnp
from jax import lax
from jax.experimental import pallas as pl
from jax.experimental.pallas import tpu as pltpu


# -----------------------------------------------------------------------------
# Fused per-layer kernel:
#   cur = x                      (first layer)
#   cur = acc + resblock1(x)     (later layers)
#   y   = resblock2(cur)
#   z   = Wf @ y                 (1x1 conv, pre-resize; commutes with resize)
#   out = z @ M2 + bf            (bilinear resize as one lane-dense matmul)
# Activations are (C, L) with L = H*W in lanes; 3x3 convs are channels-first
# matmuls (C, 9C) @ (9C, L) with in-kernel (VMEM) im2col.
# -----------------------------------------------------------------------------

def _layer_kernel(*refs, H, W, OH, OW, C, has_acc):
    f32 = jnp.float32
    bf16 = jnp.bfloat16
    L = H * W
    PAD = W + 1          # one zero row + one guard element on each side
    OL = OH * OW

    idx = 0
    x_ref = refs[idx]; idx += 1
    if has_acc:
        acc_ref = refs[idx]; idx += 1
        r1w1, r1b1, r1w2, r1b2 = refs[idx:idx + 4]; idx += 4
    r2w1, r2b1, r2w2, r2b2 = refs[idx:idx + 4]; idx += 4
    wf_ref, bff_ref, m2_ref = refs[idx:idx + 3]; idx += 3
    o_ref = refs[idx]; idx += 1
    xp_s, pat_s, cur_s = refs[idx:idx + 3]

    # Lane masks zeroing horizontally out-of-range taps (a flat-index shift
    # wraps across image rows at the left / right image borders).
    col = lax.broadcasted_iota(jnp.int32, (1, L), 1) % W
    not_left = col != 0            # dx = -1 taps are invalid at column 0
    not_right = col != (W - 1)     # dx = +1 taps are invalid at column W-1

    # Zero the guard regions of the padded scratch ONCE per invocation; the
    # im2col passes below only rewrite the interior.
    xp_s[:, 0:PAD] = jnp.zeros((C, PAD), bf16)
    xp_s[:, PAD + L:PAD + L + PAD] = jnp.zeros((C, PAD), bf16)

    def im2col(read_fn):
        """read_fn() -> (C, L) f32 pre-activation.  ReLU + ONE bf16 cast while
        writing the padded interior, then 9 shifted tap copies into pat_s."""
        xp_s[:, PAD:PAD + L] = jnp.maximum(read_fn(), 0.0).astype(bf16)
        for t in range(9):
            dy, dx = t // 3, t % 3            # kernel offset (dy-1, dx-1)
            start = dy * W + dx               # flat shift into the padded copy
            tap = xp_s[:, start:start + L]
            if dx == 0:
                tap = jnp.where(not_left, tap, 0.0)
            elif dx == 2:
                tap = jnp.where(not_right, tap, 0.0)
            pat_s[t * C:(t + 1) * C, :] = tap

    def resblock(read_fn, w1, b1, w2, b2):
        """conv2(relu(conv1(relu(a)))) + a.  `a` is re-read from VMEM at the
        residual add so it is not held live across the two K=9C matmuls."""
        im2col(read_fn)
        h = jnp.dot(w1[...], pat_s[...], preferred_element_type=f32) + b1[...]
        im2col(lambda: h)
        return (jnp.dot(w2[...], pat_s[...], preferred_element_type=f32)
                + b2[...] + read_fn())

    read_x = lambda: x_ref[0].astype(f32)                           # (C, L)
    if has_acc:
        # PyTorch: out_of_layer = acc + res1(hidden_state)
        cur_s[...] = acc_ref[0].astype(f32) + resblock(read_x, r1w1, r1b1,
                                                       r1w2, r1b2)
    else:
        cur_s[...] = read_x()

    y = resblock(lambda: cur_s[...], r2w1, r2b1, r2w2, r2b2)        # (C, L)

    # Fused 1x1 final conv applied BEFORE the bilinear upsample (they commute:
    # every output pixel's interpolation weights sum to exactly 1).
    z = jnp.dot(wf_ref[...], y.astype(bf16), preferred_element_type=f32)

    # Bilinear resize as a single lane-dense matmul against the precomputed
    # Kronecker interpolation matrix; the 1x1 bias is added after (exact,
    # since true interpolation column sums are 1).
    r = jnp.dot(z.astype(bf16), m2_ref[...], preferred_element_type=f32)
    o_ref[0] = (r + bff_ref[...]).astype(o_ref.dtype)               # (C, OL)


def _layer_call(x, acc, p, out_hw):
    """One fused pyramid layer.  x, acc: (N, C, H, W) f32 (same spatial size);
    p: prepared params; out_hw: output spatial size of the bilinear resize."""
    N, C, H, W = x.shape
    L = H * W
    OH, OW = int(out_hw[0]), int(out_hw[1])
    OL = OH * OW
    m2 = _kron_interp_matrix(H, W, OH, OW, True)     # align_corners=True path

    has_acc = acc is not None
    args = [x.reshape(N, C, L)]
    in_specs = [pl.BlockSpec((1, C, L), lambda n: (n, 0, 0))]
    if has_acc:
        r1 = p["res1"]
        args += [acc.reshape(N, C, L), r1["w1"], r1["b1"], r1["w2"], r1["b2"]]
        in_specs += [pl.BlockSpec((1, C, L), lambda n: (n, 0, 0)),
                     pl.BlockSpec((C, 9 * C), lambda n: (0, 0)),
                     pl.BlockSpec((C, 1), lambda n: (0, 0)),
                     pl.BlockSpec((C, 9 * C), lambda n: (0, 0)),
                     pl.BlockSpec((C, 1), lambda n: (0, 0))]
    r2 = p["res2"]
    args += [r2["w1"], r2["b1"], r2["w2"], r2["b2"],
             p["final"]["w"], p["final"]["b"], m2]
    in_specs += [pl.BlockSpec((C, 9 * C), lambda n: (0, 0)),
                 pl.BlockSpec((C, 1), lambda n: (0, 0)),
                 pl.BlockSpec((C, 9 * C), lambda n: (0, 0)),
                 pl.BlockSpec((C, 1), lambda n: (0, 0)),
                 pl.BlockSpec((C, C), lambda n: (0, 0)),
                 pl.BlockSpec((C, 1), lambda n: (0, 0)),
                 pl.BlockSpec((L, OL), lambda n: (0, 0))]

    kern = functools.partial(_layer_kernel, H=H, W=W, OH=OH, OW=OW, C=C,
                             has_acc=has_acc)
    out = pl.pallas_call(
        kern,
        out_shape=jax.ShapeDtypeStruct((N, C, OL), x.dtype),
        grid_spec=pltpu.PrefetchScalarGridSpec(
            num_scalar_prefetch=0,
            grid=(N,),
            in_specs=in_specs,
            out_specs=pl.BlockSpec((1, C, OL), lambda n: (n, 0, 0)),
            scratch_shapes=[pltpu.VMEM((C, L + 2 * (W + 1)), jnp.bfloat16),
                            pltpu.VMEM((9 * C, L), jnp.bfloat16),
                            pltpu.VMEM((C, L), jnp.float32)],
        ),
        compiler_params=pltpu.CompilerParams(
            dimension_semantics=("parallel",),
            vmem_limit_bytes=48 * 1024 * 1024),
    )(*args)
    return out.reshape(N, C, OH, OW)


# -----------------------------------------------------------------------------
# Bilinear interpolation matrices (numpy, static, cached) and a standalone
# resize pallas_call (only used on the unexercised accumulator-shape-mismatch
# branch).
# -----------------------------------------------------------------------------

def _interp_matrix_np(in_size, out_size, align_corners):
    """(out_size, in_size) 1-D linear interpolation matrix (F.interpolate)."""
    if out_size == 1:
        src = np.array([0.0 if align_corners else in_size / 2.0 - 0.5])
    elif align_corners:
        src = np.arange(out_size, dtype=np.float64) * (in_size - 1) / (out_size - 1)
    else:
        src = (np.arange(out_size, dtype=np.float64) + 0.5) * (in_size / out_size) - 0.5
    src = np.clip(src, 0.0, in_size - 1)
    lo = np.clip(np.floor(src).astype(np.int64), 0, in_size - 1)
    hi = np.minimum(lo + 1, in_size - 1)
    frac = src - lo
    m = np.zeros((out_size, in_size), np.float64)
    m[np.arange(out_size), lo] += 1.0 - frac
    m[np.arange(out_size), hi] += frac
    return m


@functools.lru_cache(maxsize=None)
def _kron_interp_matrix(in_h, in_w, out_h, out_w, align_corners):
    """(H*W, OH*OW) bf16 matrix with M2[h*W+w, oh*OW+ow] = Mh[oh,h]*Mw[ow,w]."""
    mh = _interp_matrix_np(in_h, out_h, align_corners)          # (OH, H)
    mw = _interp_matrix_np(in_w, out_w, align_corners)          # (OW, W)
    m2 = np.einsum("ah,bw->hwab", mh, mw).reshape(in_h * in_w, out_h * out_w)
    return jnp.asarray(m2, dtype=jnp.bfloat16)


def _resize_kernel(x_ref, m2_ref, o_ref):
    o_ref[0] = jnp.dot(x_ref[0].astype(jnp.bfloat16), m2_ref[...],
                       preferred_element_type=jnp.float32).astype(o_ref.dtype)


def bilinear_resize(x, out_hw, *, align_corners):
    """Bilinear resize of an NCHW tensor as one lane-dense matmul."""
    N, C, H, W = x.shape
    OH, OW = int(out_hw[0]), int(out_hw[1])
    if (OH, OW) == (H, W):
        return x
    L, OL = H * W, OH * OW
    m2 = _kron_interp_matrix(H, W, OH, OW, bool(align_corners))
    out = pl.pallas_call(
        _resize_kernel,
        out_shape=jax.ShapeDtypeStruct((N, C, OL), x.dtype),
        grid_spec=pltpu.PrefetchScalarGridSpec(
            num_scalar_prefetch=0,
            grid=(N,),
            in_specs=[pl.BlockSpec((1, C, L), lambda n: (n, 0, 0)),
                      pl.BlockSpec((L, OL), lambda n: (0, 0))],
            out_specs=pl.BlockSpec((1, C, OL), lambda n: (n, 0, 0)),
        ),
        compiler_params=pltpu.CompilerParams(
            dimension_semantics=("parallel",),
            vmem_limit_bytes=48 * 1024 * 1024),
    )(x.reshape(N, C, L), m2)
    return out.reshape(N, C, OH, OW)


# -----------------------------------------------------------------------------
# Model composition (mirrors the PyTorch module structure, NCHW)
# -----------------------------------------------------------------------------

def upwards_forward(hidden_states, params):
    hs = hidden_states[::-1]
    outs = []
    acc = None
    for i in range(len(hs)):
        if i != len(hs) - 1:
            scale = hs[i + 1].shape[2:4]
        else:
            scale = tuple(2 * s for s in hs[i].shape[2:4])
        x_feat = hs[i]
        if acc is not None and x_feat.shape != acc.shape:
            # TODO(synk): not exercised by the standard dyadic pyramid shapes.
            x_feat = bilinear_resize(x_feat, acc.shape[2:4], align_corners=False)
        y = _layer_call(x_feat, acc, params[i], scale)
        acc = y
        outs.append(y)
    return outs


# -----------------------------------------------------------------------------
# Deterministic parameter init (PyTorch-default-like uniform bounds, OIHW)
# and conversion to the matmul-friendly kernel layout.
# -----------------------------------------------------------------------------

def _conv_init(key, cout, cin, k):
    kw, kb = jax.random.split(key)
    bound = 1.0 / float(cin * k * k) ** 0.5
    w = jax.random.uniform(kw, (cout, cin, k, k), jnp.float32, -bound, bound)
    b = jax.random.uniform(kb, (cout,), jnp.float32, -bound, bound)
    return w, b


def init_layer_params(key, c):
    ks = jax.random.split(key, 5)
    r1w1, r1b1 = _conv_init(ks[0], c, c, 3)
    r1w2, r1b2 = _conv_init(ks[1], c, c, 3)
    r2w1, r2b1 = _conv_init(ks[2], c, c, 3)
    r2w2, r2b2 = _conv_init(ks[3], c, c, 3)
    fw, fb = _conv_init(ks[4], c, c, 1)
    return {
        "res1": {"w1": r1w1, "b1": r1b1, "w2": r1w2, "b2": r1b2},
        "res2": {"w1": r2w1, "b1": r2b1, "w2": r2w2, "b2": r2b2},
        "final": {"w": fw, "b": fb},
    }


def prepare_layer_params(p):
    """OIHW 3x3 weights -> (Cout, 9*Cin) bf16 (tap-major, matching the in-kernel
    im2col ordering); 1x1 weight -> (Cout, Cin) bf16; biases -> (Cout, 1) f32."""
    def conv3(w, b):
        cout = w.shape[0]
        wm = jnp.transpose(w, (0, 2, 3, 1)).reshape(cout, -1).astype(jnp.bfloat16)
        return wm, b.reshape(cout, 1).astype(jnp.float32)

    out = {}
    for name in ("res1", "res2"):
        w1, b1 = conv3(p[name]["w1"], p[name]["b1"])
        w2, b2 = conv3(p[name]["w2"], p[name]["b2"])
        out[name] = {"w1": w1, "b1": b1, "w2": w2, "b2": b2}
    fw = p["final"]["w"]
    cout = fw.shape[0]
    out["final"] = {"w": fw.reshape(cout, cout).astype(jnp.bfloat16),
                    "b": p["final"]["b"].reshape(cout, 1).astype(jnp.float32)}
    return out


if __name__ == "__main__":
    key = jax.random.PRNGKey(0)
    k_in, k_par = jax.random.split(key)

    hidden_dim = 32
    batch = 2
    # Feature pyramid fed to Upwards (largest first, as an encoder would emit);
    # the module reverses it internally. NCHW layout, matching PyTorch.
    spatials = [32, 16, 8, 4]
    hidden_states = [
        jax.random.normal(jax.random.fold_in(k_in, i),
                          (batch, hidden_dim, s, s), jnp.float32)
        for i, s in enumerate(spatials)
    ]
    raw_params = [init_layer_params(jax.random.fold_in(k_par, i), hidden_dim)
                  for i in range(4)]
    params = [prepare_layer_params(p) for p in raw_params]

    outs = upwards_forward(hidden_states, params)
    outs = jax.block_until_ready(outs)

    # Expected output spatial sizes: 8, 16, 32, 64 (NCHW, hidden_dim channels).
    expected = [(batch, hidden_dim, 8, 8), (batch, hidden_dim, 16, 16),
                (batch, hidden_dim, 32, 32), (batch, hidden_dim, 64, 64)]
    assert [tuple(o.shape) for o in outs] == expected, [o.shape for o in outs]
    assert all(bool(jnp.isfinite(o).all()) for o in outs)
    print("KERNEL_OK")
</pallas_src>

<mosaic_0001>
module attributes {stable_mosaic.version = 11 : i64} {
  func.func @_layer_kernel(%arg0: i32, %arg1: memref<1x32x16xf32, #tpu.memory_space<vmem>>, %arg2: memref<32x288xbf16, #tpu.memory_space<vmem>>, %arg3: memref<32x1xf32, #tpu.memory_space<vmem>>, %arg4: memref<32x288xbf16, #tpu.memory_space<vmem>>, %arg5: memref<32x1xf32, #tpu.memory_space<vmem>>, %arg6: memref<32x32xbf16, #tpu.memory_space<vmem>>, %arg7: memref<32x1xf32, #tpu.memory_space<vmem>>, %arg8: memref<16x64xbf16, #tpu.memory_space<vmem>>, %arg9: memref<1x32x64xf32, #tpu.memory_space<vmem>>, %arg10: memref<32x26xbf16, #tpu.memory_space<vmem>>, %arg11: memref<288x16xbf16, #tpu.memory_space<vmem>>, %arg12: memref<32x16xf32, #tpu.memory_space<vmem>>) attributes {dimension_semantics = [#tpu.dimension_semantics<parallel>], iteration_bounds = array<i64: 2>, scalar_prefetch = 0 : i64, scratch_operands = 3 : i64, tpu.core_type = #tpu.core_type<tc>, window_params = [{transform_indices = @transform_0, window_bounds = array<i64: 1, 32, 16>}, {pipeline_mode = #tpu.pipeline_mode<synchronous>, transform_indices = @transform_1, window_bounds = array<i64: 32, 288>}, {pipeline_mode = #tpu.pipeline_mode<synchronous>, transform_indices = @transform_2, window_bounds = array<i64: 32, 1>}, {pipeline_mode = #tpu.pipeline_mode<synchronous>, transform_indices = @transform_3, window_bounds = array<i64: 32, 288>}, {pipeline_mode = #tpu.pipeline_mode<synchronous>, transform_indices = @transform_4, window_bounds = array<i64: 32, 1>}, {pipeline_mode = #tpu.pipeline_mode<synchronous>, transform_indices = @transform_5, window_bounds = array<i64: 32, 32>}, {pipeline_mode = #tpu.pipeline_mode<synchronous>, transform_indices = @transform_6, window_bounds = array<i64: 32, 1>}, {pipeline_mode = #tpu.pipeline_mode<synchronous>, transform_indices = @transform_7, window_bounds = array<i64: 16, 64>}, {transform_indices = @transform_8, window_bounds = array<i64: 1, 32, 64>}]} {
    %0 = tpu.iota {dimensions = array<i32: 1>} : vector<1x16xi32>
    %c4_i32 = arith.constant 4 : i32
    %c0_i32 = arith.constant 0 : i32
    %1 = arith.cmpi eq, %c4_i32, %c0_i32 : i32
    %c1_i32 = arith.constant 1 : i32
    %2 = arith.select %1, %c1_i32, %c4_i32 : i32
    %3 = vector.broadcast %2 : i32 to vector<1x16xi32>
    %4 = arith.remsi %0, %3 : vector<1x16xi32>
    %c0_i32_0 = arith.constant 0 : i32
    %5 = vector.broadcast %c0_i32_0 : i32 to vector<1x16xi32>
    %6 = arith.cmpi ne, %4, %5 : vector<1x16xi32>
    %c0_i32_1 = arith.constant 0 : i32
    %7 = vector.broadcast %c0_i32_1 : i32 to vector<1x16xi32>
    %8 = arith.cmpi slt, %4, %7 : vector<1x16xi32>
    %c0_i32_2 = arith.constant 0 : i32
    %9 = arith.cmpi slt, %2, %c0_i32_2 : i32
    %10 = vector.broadcast %9 : i1 to vector<1x16xi1>
    %11 = vector.broadcast %10 : vector<1x16xi1> to vector<1x16xi1>
    %12 = arith.xori %8, %11 : vector<1x16xi1>
    %13 = arith.andi %12, %6 : vector<1x16xi1>
    %14 = vector.broadcast %2 : i32 to vector<1x16xi32>
    %15 = arith.addi %4, %14 : vector<1x16xi32>
    %16 = arith.select %13, %15, %4 : vector<1x16xi1>, vector<1x16xi32>
    %c0_i32_3 = arith.constant 0 : i32
    %17 = vector.broadcast %c0_i32_3 : i32 to vector<1x16xi32>
    %18 = arith.cmpi ne, %16, %17 : vector<1x16xi32>
    %c3_i32 = arith.constant 3 : i32
    %19 = vector.broadcast %c3_i32 : i32 to vector<1x16xi32>
    %20 = arith.cmpi ne, %16, %19 : vector<1x16xi32>
    %cst = arith.constant 0.000000e+00 : bf16
    %21 = vector.broadcast %cst : bf16 to vector<32x5xbf16>
    %c0 = arith.constant 0 : index
    %c0_4 = arith.constant 0 : index
    %22 = vector.load %arg10[%c0, %c0_4] : memref<32x26xbf16, #tpu.memory_space<vmem>>, vector<32x5xbf16>
    tpu.vector_store %arg10[%c0, %c0_4], %21 {strides = array<i32>} : memref<32x26xbf16, #tpu.memory_space<vmem>>, vector<32x5xbf16>,
    %cst_5 = arith.constant 0.000000e+00 : bf16
    %23 = vector.broadcast %cst_5 : bf16 to vector<32x5xbf16>
    %c0_6 = arith.constant 0 : index
    %c21 = arith.constant 21 : index
    %24 = vector.load %arg10[%c0_6, %c21] : memref<32x26xbf16, #tpu.memory_space<vmem>>, vector<32x5xbf16>
    tpu.vector_store %arg10[%c0_6, %c21], %23 {strides = array<i32>} : memref<32x26xbf16, #tpu.memory_space<vmem>>, vector<32x5xbf16>,
    %c0_7 = arith.constant 0 : index
    %c0_8 = arith.constant 0 : index
    %c0_9 = arith.constant 0 : index
    %25 = vector.load %arg1[%c0_7, %c0_8, %c0_9] : memref<1x32x16xf32, #tpu.memory_space<vmem>>, vector<1x32x16xf32>
    %26 = vector.shape_cast %25 : vector<1x32x16xf32> to vector<32x16xf32>
    %c0_10 = arith.constant 0 : index
    %c0_11 = arith.constant 0 : index
    %27 = vector.load %arg12[%c0_10, %c0_11] : memref<32x16xf32, #tpu.memory_space<vmem>>, vector<32x16xf32>
    tpu.vector_store %arg12[%c0_10, %c0_11], %26 {strides = array<i32>} : memref<32x16xf32, #tpu.memory_space<vmem>>, vector<32x16xf32>,
    %c0_12 = arith.constant 0 : index
    %c0_13 = arith.constant 0 : index
    %28 = vector.load %arg12[%c0_12, %c0_13] : memref<32x16xf32, #tpu.memory_space<vmem>>, vector<32x16xf32>
    %cst_14 = arith.constant 0.000000e+00 : f32
    %29 = vector.broadcast %cst_14 : f32 to vector<32x16xf32>
    %30 = arith.maximumf %28, %29 : vector<32x16xf32>
    %31 = arith.truncf %30 : vector<32x16xf32> to vector<32x16xbf16>
    %c0_15 = arith.constant 0 : index
    %c5 = arith.constant 5 : index
    %32 = vector.load %arg10[%c0_15, %c5] : memref<32x26xbf16, #tpu.memory_space<vmem>>, vector<32x16xbf16>
    tpu.vector_store %arg10[%c0_15, %c5], %31 {strides = array<i32>} : memref<32x26xbf16, #tpu.memory_space<vmem>>, vector<32x16xbf16>,
    %c0_16 = arith.constant 0 : index
    %c0_17 = arith.constant 0 : index
    %33 = vector.load %arg10[%c0_16, %c0_17] : memref<32x26xbf16, #tpu.memory_space<vmem>>, vector<32x16xbf16>
    %cst_18 = arith.constant 0.000000e+00 : f32
    %34 = arith.truncf %cst_18 : f32 to bf16
    %35 = vector.shape_cast %18 : vector<1x16xi1> to vector<1x16xi1>
    %36 = vector.broadcast %35 : vector<1x16xi1> to vector<32x16xi1>
    %37 = vector.broadcast %34 : bf16 to vector<32x16xbf16>
    %38 = arith.select %36, %33, %37 : vector<32x16xi1>, vector<32x16xbf16>
    %c0_19 = arith.constant 0 : index
    %c0_20 = arith.constant 0 : index
    %39 = vector.load %arg11[%c0_19, %c0_20] : memref<288x16xbf16, #tpu.memory_space<vmem>>, vector<32x16xbf16>
    tpu.vector_store %arg11[%c0_19, %c0_20], %38 {strides = array<i32>} : memref<288x16xbf16, #tpu.memory_space<vmem>>, vector<32x16xbf16>,
    %c0_21 = arith.constant 0 : index
    %c1 = arith.constant 1 : index
    %40 = vector.load %arg10[%c0_21, %c1] : memref<32x26xbf16, #tpu.memory_space<vmem>>, vector<32x16xbf16>
    %c32 = arith.constant 32 : index
    %c0_22 = arith.constant 0 : index
    %41 = vector.load %arg11[%c32, %c0_22] : memref<288x16xbf16, #tpu.memory_space<vmem>>, vector<32x16xbf16>
    tpu.vector_store %arg11[%c32, %c0_22], %40 {strides = array<i32>} : memref<288x16xbf16, #tpu.memory_space<vmem>>, vector<32x16xbf16>,
    %c0_23 = arith.constant 0 : index
    %c2 = arith.constant 2 : index
    %42 = vector.load %arg10[%c0_23, %c2] : memref<32x26xbf16, #tpu.memory_space<vmem>>, vector<32x16xbf16>
    %cst_24 = arith.constant 0.000000e+00 : f32
    %43 = arith.truncf %cst_24 : f32 to bf16
    %44 = vector.shape_cast %20 : vector<1x16xi1> to vector<1x16xi1>
    %45 = vector.broadcast %44 : vector<1x16xi1> to vector<32x16xi1>
    %46 = vector.broadcast %43 : bf16 to vector<32x16xbf16>
    %47 = arith.select %45, %42, %46 : vector<32x16xi1>, vector<32x16xbf16>
    %c64 = arith.constant 64 : index
    %c0_25 = arith.constant 0 : index
    %48 = vector.load %arg11[%c64, %c0_25] : memref<288x16xbf16, #tpu.memory_space<vmem>>, vector<32x16xbf16>
    tpu.vector_store %arg11[%c64, %c0_25], %47 {strides = array<i32>} : memref<288x16xbf16, #tpu.memory_space<vmem>>, vector<32x16xbf16>,
    %c0_26 = arith.constant 0 : index
    %c4 = arith.constant 4 : index
    %49 = vector.load %arg10[%c0_26, %c4] : memref<32x26xbf16, #tpu.memory_space<vmem>>, vector<32x16xbf16>
    %cst_27 = arith.constant 0.000000e+00 : f32
    %50 = arith.truncf %cst_27 : f32 to bf16
    %51 = vector.shape_cast %18 : vector<1x16xi1> to vector<1x16xi1>
    %52 = vector.broadcast %51 : vector<1x16xi1> to vector<32x16xi1>
    %53 = vector.broadcast %50 : bf16 to vector<32x16xbf16>
    %54 = arith.select %52, %49, %53 : vector<32x16xi1>, vector<32x16xbf16>
    %c96 = arith.constant 96 : index
    %c0_28 = arith.constant 0 : index
    %55 = vector.load %arg11[%c96, %c0_28] : memref<288x16xbf16, #tpu.memory_space<vmem>>, vector<32x16xbf16>
    tpu.vector_store %arg11[%c96, %c0_28], %54 {strides = array<i32>} : memref<288x16xbf16, #tpu.memory_space<vmem>>, vector<32x16xbf16>,
    %c0_29 = arith.constant 0 : index
    %c5_30 = arith.constant 5 : index
    %56 = vector.load %arg10[%c0_29, %c5_30] : memref<32x26xbf16, #tpu.memory_space<vmem>>, vector<32x16xbf16>
    %c128 = arith.constant 128 : index
    %c0_31 = arith.constant 0 : index
    %57 = vector.load %arg11[%c128, %c0_31] : memref<288x16xbf16, #tpu.memory_space<vmem>>, vector<32x16xbf16>
    tpu.vector_store %arg11[%c128, %c0_31], %56 {strides = array<i32>} : memref<288x16xbf16, #tpu.memory_space<vmem>>, vector<32x16xbf16>,
    %c0_32 = arith.constant 0 : index
    %c6 = arith.constant 6 : index
    %58 = vector.load %arg10[%c0_32, %c6] : memref<32x26xbf16, #tpu.memory_space<vmem>>, vector<32x16xbf16>
    %cst_33 = arith.constant 0.000000e+00 : f32
    %59 = arith.truncf %cst_33 : f32 to bf16
    %60 = vector.shape_cast %20 : vector<1x16xi1> to vector<1x16xi1>
    %61 = vector.broadcast %60 : vector<1x16xi1> to vector<32x16xi1>
    %62 = vector.broadcast %59 : bf16 to vector<32x16xbf16>
    %63 = arith.select %61, %58, %62 : vector<32x16xi1>, vector<32x16xbf16>
    %c160 = arith.constant 160 : index
    %c0_34 = arith.constant 0 : index
    %64 = vector.load %arg11[%c160, %c0_34] : memref<288x16xbf16, #tpu.memory_space<vmem>>, vector<32x16xbf16>
    tpu.vector_store %arg11[%c160, %c0_34], %63 {strides = array<i32>} : memref<288x16xbf16, #tpu.memory_space<vmem>>, vector<32x16xbf16>,
    %c0_35 = arith.constant 0 : index
    %c8 = arith.constant 8 : index
    %65 = vector.load %arg10[%c0_35, %c8] : memref<32x26xbf16, #tpu.memory_space<vmem>>, vector<32x16xbf16>
    %cst_36 = arith.constant 0.000000e+00 : f32
    %66 = arith.truncf %cst_36 : f32 to bf16
    %67 = vector.shape_cast %18 : vector<1x16xi1> to vector<1x16xi1>
    %68 = vector.broadcast %67 : vector<1x16xi1> to vector<32x16xi1>
    %69 = vector.broadcast %66 : bf16 to vector<32x16xbf16>
    %70 = arith.select %68, %65, %69 : vector<32x16xi1>, vector<32x16xbf16>
    %c192 = arith.constant 192 : index
    %c0_37 = arith.constant 0 : index
    %71 = vector.load %arg11[%c192, %c0_37] : memref<288x16xbf16, #tpu.memory_space<vmem>>, vector<32x16xbf16>
    tpu.vector_store %arg11[%c192, %c0_37], %70 {strides = array<i32>} : memref<288x16xbf16, #tpu.memory_space<vmem>>, vector<32x16xbf16>,
    %c0_38 = arith.constant 0 : index
    %c9 = arith.constant 9 : index
    %72 = vector.load %arg10[%c0_38, %c9] : memref<32x26xbf16, #tpu.memory_space<vmem>>, vector<32x16xbf16>
    %c224 = arith.constant 224 : index
    %c0_39 = arith.constant 0 : index
    %73 = vector.load %arg11[%c224, %c0_39] : memref<288x16xbf16, #tpu.memory_space<vmem>>, vector<32x16xbf16>
    tpu.vector_store %arg11[%c224, %c0_39], %72 {strides = array<i32>} : memref<288x16xbf16, #tpu.memory_space<vmem>>, vector<32x16xbf16>,
    %c0_40 = arith.constant 0 : index
    %c10 = arith.constant 10 : index
    %74 = vector.load %arg10[%c0_40, %c10] : memref<32x26xbf16, #tpu.memory_space<vmem>>, vector<32x16xbf16>
    %cst_41 = arith.constant 0.000000e+00 : f32
    %75 = arith.truncf %cst_41 : f32 to bf16
    %76 = vector.shape_cast %20 : vector<1x16xi1> to vector<1x16xi1>
    %77 = vector.broadcast %76 : vector<1x16xi1> to vector<32x16xi1>
    %78 = vector.broadcast %75 : bf16 to vector<32x16xbf16>
    %79 = arith.select %77, %74, %78 : vector<32x16xi1>, vector<32x16xbf16>
    %c256 = arith.constant 256 : index
    %c0_42 = arith.constant 0 : index
    %80 = vector.load %arg11[%c256, %c0_42] : memref<288x16xbf16, #tpu.memory_space<vmem>>, vector<32x16xbf16>
    tpu.vector_store %arg11[%c256, %c0_42], %79 {strides = array<i32>} : memref<288x16xbf16, #tpu.memory_space<vmem>>, vector<32x16xbf16>,
    %c0_43 = arith.constant 0 : index
    %c0_44 = arith.constant 0 : index
    %81 = vector.load %arg2[%c0_43, %c0_44] : memref<32x288xbf16, #tpu.memory_space<vmem>>, vector<32x288xbf16>
    %c0_45 = arith.constant 0 : index
    %c0_46 = arith.constant 0 : index
    %82 = vector.load %arg11[%c0_45, %c0_46] : memref<288x16xbf16, #tpu.memory_space<vmem>>, vector<288x16xbf16>
    %cst_47 = arith.constant dense<0.000000e+00> : vector<32x16xf32>
    %83 = tpu.matmul %81, %82, %cst_47 {dimension_numbers = #tpu.dot_dimension_numbers<[1], [0], [0], [1], [0, 0, 1, 1], [], []>} : vector<32x288xbf16>, vector<288x16xbf16>, vector<32x16xf32> -> vector<32x16xf32>
    %c0_48 = arith.constant 0 : index
    %c0_49 = arith.constant 0 : index
    %84 = vector.load %arg3[%c0_48, %c0_49] : memref<32x1xf32, #tpu.memory_space<vmem>>, vector<32x1xf32>
    %85 = vector.broadcast %84 : vector<32x1xf32> to vector<32x16xf32>
    %86 = arith.addf %83, %85 : vector<32x16xf32>
    %cst_50 = arith.constant 0.000000e+00 : f32
    %87 = vector.broadcast %cst_50 : f32 to vector<32x16xf32>
    %88 = arith.maximumf %86, %87 : vector<32x16xf32>
    %89 = arith.truncf %88 : vector<32x16xf32> to vector<32x16xbf16>
    %c0_51 = arith.constant 0 : index
    %c5_52 = arith.constant 5 : index
    %90 = vector.load %arg10[%c0_51, %c5_52] : memref<32x26xbf16, #tpu.memory_space<vmem>>, vector<32x16xbf16>
    tpu.vector_store %arg10[%c0_51, %c5_52], %89 {strides = array<i32>} : memref<32x26xbf16, #tpu.memory_space<vmem>>, vector<32x16xbf16>,
    %c0_53 = arith.constant 0 : index
    %c0_54 = arith.constant 0 : index
    %91 = vector.load %arg10[%c0_53, %c0_54] : memref<32x26xbf16, #tpu.memory_space<vmem>>, vector<32x16xbf16>
    %cst_55 = arith.constant 0.000000e+00 : f32
    %92 = arith.truncf %cst_55 : f32 to bf16
    %93 = vector.shape_cast %18 : vector<1x16xi1> to vector<1x16xi1>
    %94 = vector.broadcast %93 : vector<1x16xi1> to vector<32x16xi1>
    %95 = vector.broadcast %92 : bf16 to vector<32x16xbf16>
    %96 = arith.select %94, %91, %95 : vector<32x16xi1>, vector<32x16xbf16>
    %c0_56 = arith.constant 0 : index
    %c0_57 = arith.constant 0 : index
    %97 = vector.load %arg11[%c0_56, %c0_57] : memref<288x16xbf16, #tpu.memory_space<vmem>>, vector<32x16xbf16>
    tpu.vector_store %arg11[%c0_56, %c0_57], %96 {strides = array<i32>} : memref<288x16xbf16, #tpu.memory_space<vmem>>, vector<32x16xbf16>,
    %c0_58 = arith.constant 0 : index
    %c1_59 = arith.constant 1 : index
    %98 = vector.load %arg10[%c0_58, %c1_59] : memref<32x26xbf16, #tpu.memory_space<vmem>>, vector<32x16xbf16>
    %c32_60 = arith.constant 32 : index
    %c0_61 = arith.constant 0 : index
    %99 = vector.load %arg11[%c32_60, %c0_61] : memref<288x16xbf16, #tpu.memory_space<vmem>>, vector<32x16xbf16>
    tpu.vector_store %arg11[%c32_60, %c0_61], %98 {strides = array<i32>} : memref<288x16xbf16, #tpu.memory_space<vmem>>, vector<32x16xbf16>,
    %c0_62 = arith.constant 0 : index
    %c2_63 = arith.constant 2 : index
    %100 = vector.load %arg10[%c0_62, %c2_63] : memref<32x26xbf16, #tpu.memory_space<vmem>>, vector<32x16xbf16>
    %cst_64 = arith.constant 0.000000e+00 : f32
    %101 = arith.truncf %cst_64 : f32 to bf16
    %102 = vector.shape_cast %20 : vector<1x16xi1> to vector<1x16xi1>
    %103 = vector.broadcast %102 : vector<1x16xi1> to vector<32x16xi1>
    %104 = vector.broadcast %101 : bf16 to vector<32x16xbf16>
    %105 = arith.select %103, %100, %104 : vector<32x16xi1>, vector<32x16xbf16>
    %c64_65 = arith.constant 64 : index
    %c0_66 = arith.constant 0 : index
    %106 = vector.load %arg11[%c64_65, %c0_66] : memref<288x16xbf16, #tpu.memory_space<vmem>>, vector<32x16xbf16>
    tpu.vector_store %arg11[%c64_65, %c0_66], %105 {strides = array<i32>} : memref<288x16xbf16, #tpu.memory_space<vmem>>, vector<32x16xbf16>,
    %c0_67 = arith.constant 0 : index
    %c4_68 = arith.constant 4 : index
    %107 = vector.load %arg10[%c0_67, %c4_68] : memref<32x26xbf16, #tpu.memory_space<vmem>>, vector<32x16xbf16>
    %cst_69 = arith.constant 0.000000e+00 : f32
    %108 = arith.truncf %cst_69 : f32 to bf16
    %109 = vector.shape_cast %18 : vector<1x16xi1> to vector<1x16xi1>
    %110 = vector.broadcast %109 : vector<1x16xi1> to vector<32x16xi1>
    %111 = vector.broadcast %108 : bf16 to vector<32x16xbf16>
    %112 = arith.select %110, %107, %111 : vector<32x16xi1>, vector<32x16xbf16>
    %c96_70 = arith.constant 96 : index
    %c0_71 = arith.constant 0 : index
    %113 = vector.load %arg11[%c96_70, %c0_71] : memref<288x16xbf16, #tpu.memory_space<vmem>>, vector<32x16xbf16>
    tpu.vector_store %arg11[%c96_70, %c0_71], %112 {strides = array<i32>} : memref<288x16xbf16, #tpu.memory_space<vmem>>, vector<32x16xbf16>,
    %c0_72 = arith.constant 0 : index
    %c5_73 = arith.constant 5 : index
    %114 = vector.load %arg10[%c0_72, %c5_73] : memref<32x26xbf16, #tpu.memory_space<vmem>>, vector<32x16xbf16>
    %c128_74 = arith.constant 128 : index
    %c0_75 = arith.constant 0 : index
    %115 = vector.load %arg11[%c128_74, %c0_75] : memref<288x16xbf16, #tpu.memory_space<vmem>>, vector<32x16xbf16>
    tpu.vector_store %arg11[%c128_74, %c0_75], %114 {strides = array<i32>} : memref<288x16xbf16, #tpu.memory_space<vmem>>, vector<32x16xbf16>,
    %c0_76 = arith.constant 0 : index
    %c6_77 = arith.constant 6 : index
    %116 = vector.load %arg10[%c0_76, %c6_77] : memref<32x26xbf16, #tpu.memory_space<vmem>>, vector<32x16xbf16>
    %cst_78 = arith.constant 0.000000e+00 : f32
    %117 = arith.truncf %cst_78 : f32 to bf16
    %118 = vector.shape_cast %20 : vector<1x16xi1> to vector<1x16xi1>
    %119 = vector.broadcast %118 : vector<1x16xi1> to vector<32x16xi1>
    %120 = vector.broadcast %117 : bf16 to vector<32x16xbf16>
    %121 = arith.select %119, %116, %120 : vector<32x16xi1>, vector<32x16xbf16>
    %c160_79 = arith.constant 160 : index
    %c0_80 = arith.constant 0 : index
    %122 = vector.load %arg11[%c160_79, %c0_80] : memref<288x16xbf16, #tpu.memory_space<vmem>>, vector<32x16xbf16>
    tpu.vector_store %arg11[%c160_79, %c0_80], %121 {strides = array<i32>} : memref<288x16xbf16, #tpu.memory_space<vmem>>, vector<32x16xbf16>,
    %c0_81 = arith.constant 0 : index
    %c8_82 = arith.constant 8 : index
    %123 = vector.load %arg10[%c0_81, %c8_82] : memref<32x26xbf16, #tpu.memory_space<vmem>>, vector<32x16xbf16>
    %cst_83 = arith.constant 0.000000e+00 : f32
    %124 = arith.truncf %cst_83 : f32 to bf16
    %125 = vector.shape_cast %18 : vector<1x16xi1> to vector<1x16xi1>
    %126 = vector.broadcast %125 : vector<1x16xi1> to vector<32x16xi1>
    %127 = vector.broadcast %124 : bf16 to vector<32x16xbf16>
    %128 = arith.select %126, %123, %127 : vector<32x16xi1>, vector<32x16xbf16>
    %c192_84 = arith.constant 192 : index
    %c0_85 = arith.constant 0 : index
    %129 = vector.load %arg11[%c192_84, %c0_85] : memref<288x16xbf16, #tpu.memory_space<vmem>>, vector<32x16xbf16>
    tpu.vector_store %arg11[%c192_84, %c0_85], %128 {strides = array<i32>} : memref<288x16xbf16, #tpu.memory_space<vmem>>, vector<32x16xbf16>,
    %c0_86 = arith.constant 0 : index
    %c9_87 = arith.constant 9 : index
    %130 = vector.load %arg10[%c0_86, %c9_87] : memref<32x26xbf16, #tpu.memory_space<vmem>>, vector<32x16xbf16>
    %c224_88 = arith.constant 224 : index
    %c0_89 = arith.constant 0 : index
    %131 = vector.load %arg11[%c224_88, %c0_89] : memref<288x16xbf16, #tpu.memory_space<vmem>>, vector<32x16xbf16>
    tpu.vector_store %arg11[%c224_88, %c0_89], %130 {strides = array<i32>} : memref<288x16xbf16, #tpu.memory_space<vmem>>, vector<32x16xbf16>,
    %c0_90 = arith.constant 0 : index
    %c10_91 = arith.constant 10 : index
    %132 = vector.load %arg10[%c0_90, %c10_91] : memref<32x26xbf16, #tpu.memory_space<vmem>>, vector<32x16xbf16>
    %cst_92 = arith.constant 0.000000e+00 : f32
    %133 = arith.truncf %cst_92 : f32 to bf16
    %134 = vector.shape_cast %20 : vector<1x16xi1> to vector<1x16xi1>
    %135 = vector.broadcast %134 : vector<1x16xi1> to vector<32x16xi1>
    %136 = vector.broadcast %133 : bf16 to vector<32x16xbf16>
    %137 = arith.select %135, %132, %136 : vector<32x16xi1>, vector<32x16xbf16>
    %c256_93 = arith.constant 256 : index
    %c0_94 = arith.constant 0 : index
    %138 = vector.load %arg11[%c256_93, %c0_94] : memref<288x16xbf16, #tpu.memory_space<vmem>>, vector<32x16xbf16>
    tpu.vector_store %arg11[%c256_93, %c0_94], %137 {strides = array<i32>} : memref<288x16xbf16, #tpu.memory_space<vmem>>, vector<32x16xbf16>,
    %c0_95 = arith.constant 0 : index
    %c0_96 = arith.constant 0 : index
    %139 = vector.load %arg4[%c0_95, %c0_96] : memref<32x288xbf16, #tpu.memory_space<vmem>>, vector<32x288xbf16>
    %c0_97 = arith.constant 0 : index
    %c0_98 = arith.constant 0 : index
    %140 = vector.load %arg11[%c0_97, %c0_98] : memref<288x16xbf16, #tpu.memory_space<vmem>>, vector<288x16xbf16>
    %cst_99 = arith.constant dense<0.000000e+00> : vector<32x16xf32>
    %141 = tpu.matmul %139, %140, %cst_99 {dimension_numbers = #tpu.dot_dimension_numbers<[1], [0], [0], [1], [0, 0, 1, 1], [], []>} : vector<32x288xbf16>, vector<288x16xbf16>, vector<32x16xf32> -> vector<32x16xf32>
    %c0_100 = arith.constant 0 : index
    %c0_101 = arith.constant 0 : index
    %142 = vector.load %arg5[%c0_100, %c0_101] : memref<32x1xf32, #tpu.memory_space<vmem>>, vector<32x1xf32>
    %143 = vector.broadcast %142 : vector<32x1xf32> to vector<32x16xf32>
    %144 = arith.addf %141, %143 : vector<32x16xf32>
    %c0_102 = arith.constant 0 : index
    %c0_103 = arith.constant 0 : index
    %145 = vector.load %arg12[%c0_102, %c0_103] : memref<32x16xf32, #tpu.memory_space<vmem>>, vector<32x16xf32>
    %146 = arith.addf %144, %145 : vector<32x16xf32>
    %c0_104 = arith.constant 0 : index
    %c0_105 = arith.constant 0 : index
    %147 = vector.load %arg6[%c0_104, %c0_105] : memref<32x32xbf16, #tpu.memory_space<vmem>>, vector<32x32xbf16>
    %148 = arith.truncf %146 : vector<32x16xf32> to vector<32x16xbf16>
    %cst_106 = arith.constant dense<0.000000e+00> : vector<32x16xf32>
    %149 = tpu.matmul %147, %148, %cst_106 {dimension_numbers = #tpu.dot_dimension_numbers<[1], [0], [0], [1], [0, 0, 1, 1], [], []>} : vector<32x32xbf16>, vector<32x16xbf16>, vector<32x16xf32> -> vector<32x16xf32>
    %150 = arith.truncf %149 : vector<32x16xf32> to vector<32x16xbf16>
    %c0_107 = arith.constant 0 : index
    %c0_108 = arith.constant 0 : index
    %151 = vector.load %arg8[%c0_107, %c0_108] : memref<16x64xbf16, #tpu.memory_space<vmem>>, vector<16x64xbf16>
    %cst_109 = arith.constant dense<0.000000e+00> : vector<32x64xf32>
    %152 = tpu.matmul %150, %151, %cst_109 {dimension_numbers = #tpu.dot_dimension_numbers<[1], [0], [0], [1], [0, 0, 1, 1], [], []>} : vector<32x16xbf16>, vector<16x64xbf16>, vector<32x64xf32> -> vector<32x64xf32>
    %c0_110 = arith.constant 0 : index
    %c0_111 = arith.constant 0 : index
    %153 = vector.load %arg7[%c0_110, %c0_111] : memref<32x1xf32, #tpu.memory_space<vmem>>, vector<32x1xf32>
    %154 = vector.broadcast %153 : vector<32x1xf32> to vector<32x64xf32>
    %155 = arith.addf %152, %154 : vector<32x64xf32>
    %c0_112 = arith.constant 0 : index
    %c0_113 = arith.constant 0 : index
    %c0_114 = arith.constant 0 : index
    %156 = vector.load %arg9[%c0_112, %c0_113, %c0_114] : memref<1x32x64xf32, #tpu.memory_space<vmem>>, vector<1x32x64xf32>
    %157 = vector.shape_cast %156 : vector<1x32x64xf32> to vector<32x64xf32>
    %158 = vector.shape_cast %155 : vector<32x64xf32> to vector<1x32x64xf32>
    tpu.vector_store %arg9[%c0_112, %c0_113, %c0_114], %158 {strides = array<i32>} : memref<1x32x64xf32, #tpu.memory_space<vmem>>, vector<1x32x64xf32>,
    return
  }
  func.func @transform_0(%arg0: i32) -> (i32, i32, i32) {
    %c0_i32 = arith.constant 0 : i32
    %c0_i32_0 = arith.constant 0 : i32
    %c0_i32_1 = arith.constant 0 : i32
    return %arg0, %c0_i32, %c0_i32_0 : i32, i32, i32
  }
  func.func @transform_1(%arg0: i32) -> (i32, i32) {
    %c0_i32 = arith.constant 0 : i32
    %c0_i32_0 = arith.constant 0 : i32
    %c0_i32_1 = arith.constant 0 : i32
    return %c0_i32, %c0_i32_0 : i32, i32
  }
  func.func @transform_2(%arg0: i32) -> (i32, i32) {
    %c0_i32 = arith.constant 0 : i32
    %c0_i32_0 = arith.constant 0 : i32
    %c0_i32_1 = arith.constant 0 : i32
    return %c0_i32, %c0_i32_0 : i32, i32
  }
  func.func @transform_3(%arg0: i32) -> (i32, i32) {
    %c0_i32 = arith.constant 0 : i32
    %c0_i32_0 = arith.constant 0 : i32
    %c0_i32_1 = arith.constant 0 : i32
    return %c0_i32, %c0_i32_0 : i32, i32
  }
  func.func @transform_4(%arg0: i32) -> (i32, i32) {
    %c0_i32 = arith.constant 0 : i32
    %c0_i32_0 = arith.constant 0 : i32
    %c0_i32_1 = arith.constant 0 : i32
    return %c0_i32, %c0_i32_0 : i32, i32
  }
  func.func @transform_5(%arg0: i32) -> (i32, i32) {
    %c0_i32 = arith.constant 0 : i32
    %c0_i32_0 = arith.constant 0 : i32
    %c0_i32_1 = arith.constant 0 : i32
    return %c0_i32, %c0_i32_0 : i32, i32
  }
  func.func @transform_6(%arg0: i32) -> (i32, i32) {
    %c0_i32 = arith.constant 0 : i32
    %c0_i32_0 = arith.constant 0 : i32
    %c0_i32_1 = arith.constant 0 : i32
    return %c0_i32, %c0_i32_0 : i32, i32
  }
  func.func @transform_7(%arg0: i32) -> (i32, i32) {
    %c0_i32 = arith.constant 0 : i32
    %c0_i32_0 = arith.constant 0 : i32
    %c0_i32_1 = arith.constant 0 : i32
    return %c0_i32, %c0_i32_0 : i32, i32
  }
  func.func @transform_8(%arg0: i32) -> (i32, i32, i32) {
    %c0_i32 = arith.constant 0 : i32
    %c0_i32_0 = arith.constant 0 : i32
    %c0_i32_1 = arith.constant 0 : i32
    return %arg0, %c0_i32, %c0_i32_0 : i32, i32, i32
  }
}

</mosaic_0001>

<bundles_post_ra>
// kernel: tpu_custom_call.1
= control target key start
LH: loop header
LB: loop body
LE: loop exit
PB: predicated region body
PF: predicated region fallthrough
CT: control target
= control target key end

     0   :  { %13 = vsyncpa [#allocation6], 0  ;;  %s1951_s0 = inlined_call_operand.vmem [shape: f32[2,32,16], index: 0, kind: input, shape index: {}]   ;;  %s1952_s1 = inlined_call_operand.vmem [shape: bf16[32,288], index: 1, kind: input, shape index: {}]   ;;  %s1953_s2 = inlined_call_operand.vmem [shape: f32[32,1], index: 2, kind: input, shape index: {}]   ;;  %s1954_s3 = inlined_call_operand.vmem [shape: bf16[32,288], index: 3, kind: input, shape index: {}]   ;;  %s1955_s4 = inlined_call_operand.vmem [shape: f32[32,1], index: 4, kind: input, shape index: {}]   ;;  %s1956_s5 = inlined_call_operand.vmem [shape: bf16[32,32], index: 5, kind: input, shape index: {}]   ;;  %s1957_s6 = inlined_call_operand.vmem [shape: f32[32,1], index: 6, kind: input, shape index: {}]   ;;  %s1958_s7 = inlined_call_operand.vmem [shape: bf16[16,64], index: 7, kind: input, shape index: {}]   ;;  %s1959_s8 = inlined_call_operand.hbm [shape: f32[2,32,64], index: 8, kind: output, shape index: {}]  }
   0x1   :  { %15 = vsyncpa [#allocation6 + $0x1], 0  ;;  %s1589_s27 = smov 0   ;;  %s1591_s28 = smov 0  }
   0x2   :  { %s1593_s29 = smov 0   ;;  %s1595_s30 = smov 0  }
   0x3 LB: > { %s1610_s9 = sadd.s32 4294967295, %s1525_s30   ;;  %s1249_s10 = sadd.s32 4294967294, %s1525_s30   ;;  %s1525_s30 = sphi %s1595_s30, %s1979_s30   ;;  %s1521_s29 = sphi %s1593_s29, %s1978_s29   ;;  %s1517_s28 = sphi %s1591_s28, %s1977_s28   ;;  %s1513_s27 = sphi %s1589_s27, %s1976_s27  }
   0x4   : > { %s1614_s11 = sadd.s32 1, %s1525_s30   ;;  %s201_s12 = sadd.s32 1, %s1521_s29 }
   0x5   : > { %s198_s13 = ssub.s32 %s1525_s30, %s1614_s11  ;;  %p211_p0 = scmp.ne.s32.totalorder %s1521_s29, %s1517_s28 }
   0x6   : > { %p199_p1 = scmp.eq.s32.totalorder %s198_s13, 0  ;;  %p212_p2 = scmp.eq.s32.totalorder %s1610_s9, 1 }
   0x7   : > { %p217_p3 = scmp.ne.s32.totalorder %s1517_s28, %s1513_s27  ;;  %p218_p4 = scmp.eq.s32.totalorder %s1249_s10, 1 }
   0x8   : > { %s1625_s14 = scalar_select %p199_p1, %s1521_s29, %s201_s12  }
   0x9   : > { %p1627_p5 = por %p212_p2, %p211_p0  ;;  %p1631_p6 = por %p218_p4, %p217_p3 }
   0xa   : > { %p1252_p7 = scmp.ge.s32.totalorder %s1525_s30, 1  ;;  %p265_p8 = scmp.lt.s32.totalorder %s1525_s30, 3 }
   0xc   : > { %p266_p9 = pnand %p1252_p7, %p265_p8 }
   0xd   : > { %v307_v0 = vlaneseq (!%p266_p9)  ;;  %p299_p10 = scmp.lt.s32.totalorder (!%p266_p9), %s1610_s9, 1  ;;  %vm323_vm0 = vcmask (!%p266_p9), 39936   ;;  %v1527_v1 = vmov (!%p266_p9), 0   ;;  %vm326_vm1 = vcmask (!%p266_p9), 212136   ;;  %s1528_s22 = smov (!%p266_p9), 6   ;;  %v529_v47 = vld [vmem:[%s1953_s2] sm:$0xff] (!%p266_p9) }
   0xe   : > { %269 = sbr.rel (%p266_p9) target bundleno = 1510 (0x5e6), region = 52  ;;  %324 = vst.msk [vmem:[#allocation2] sm:$0xff] (!%p266_p9), %vm323_vm0, %v1527_v1  ;;  %325 = vst.msk [vmem:[#allocation2 + $0x8] sm:$0xff] (!%p266_p9), %vm323_vm0, %v1527_v1  ;;  %1442 = vset.pattern.permute.xlu1 (!%p266_p9), %v1527_v1  ;;  %1443 = vset.pattern.permute.xlu0 (!%p266_p9), %v1527_v1  ;;  %vm333_vm2 = vcmask (!%p266_p9), 130048   ;;  %s1960_s23 = smov (!%p266_p9), 8   ;;  %vm356_vm7 = vcmask (!%p266_p9), 171048  }
   0xf   : > { %v308_v2 = vand.u32 (!%p266_p9), 127, %v307_v0  ;;  %v366_v3 = vshrl.u32 (!%p266_p9), %v307_v0, 7  ;;  %327 = vst.msk [vmem:[#allocation2] sm:$0xff] (!%p266_p9), %vm326_vm1, %v1527_v1  ;;  %328 = vst.msk [vmem:[#allocation2 + $0x8] sm:$0xff] (!%p266_p9), %vm326_vm1, %v1527_v1  ;;  %s1530_s24 = smov (!%p266_p9), 5   ;;  %s1531_s25 = smov (!%p266_p9), 4  }
  0x10   : > { %s1532_s26 = smov (!%p266_p9), 2   ;;  %s1533_s10 = smov (!%p266_p9), 10   ;;  %v1446_v42 = vld [vmem:[%s1952_s1 + $0x4] ss:$12 sps:$4 sm:$0xff] (!%p266_p9)   ;;  %v1447_v45 = vld [vmem:[%s1952_s1 + $0x8] ss:$12 sps:$4 sm:$0xff] (!%p266_p9)  }
  0x11   : > { %v313_v4 = vand.u32 (!%p266_p9), 3, %v308_v2  ;;  %v367_v5 = vsub.s32 (!%p266_p9), 0, %v366_v3  ;;  %s1534_s12 = smov (!%p266_p9), 123   ;;  %s1535_s13 = smov (!%p266_p9), 122   ;;  %622 = vmatprep.mubr.bf16.mxu0 (!%p266_p9), %v1446_v42  ;;  %vm583_vm14 = vcmask (!%p266_p9), 261120   ;;  %v530_v48 = vld [vmem:[%s1953_s2 + $0x8] sm:$0xff] (!%p266_p9) }
  0x12   : > { %s1965_s19 = smov (!%p266_p9), 126   ;;  %s1963_s20 = smov (!%p266_p9), 119   ;;  %1361 = vmatprep.mubr.msk.bf16.mxu1 (!%p266_p9), %vm583_vm14, %v1447_v45  ;;  %v531_v49 = vld [vmem:[%s1953_s2 + $0x10] sm:$0xff] (!%p266_p9)  ;;  %v532_v50 = vld [vmem:[%s1953_s2 + $0x18] sm:$0xff] (!%p266_p9)  ;;  %vm1168_vm15 = vcmask (!%p266_p9), 523264  }
  0x13   : > { %vm322_vm3 = vcmp.ne.s32.totalorder (!%p266_p9), %v313_v4, 3  ;;  %vm321_vm4 = vcmp.ne.s32.totalorder (!%p266_p9), %v313_v4, 0 }
  0x14   : > { %vm390_vm5 = vmpackc.low (!%p266_p9), %vm322_vm3, %vm322_vm3 }
  0x15   : > { %s300_s17 = scalar_select %p299_p10, %s1610_s9, 1  ;;  %v391_v10 = vsel %vm390_vm5, 65537, %v1527_v1  ;;  %vm363_vm6 = vmpackc.low %vm321_vm4, %vm321_vm4 }
  0x16   : > { %v395_v11 = vrot.slane %v391_v10, %v367_v5  ;;  %v364_v12 = vsel %vm363_vm6, 65537, %v1527_v1 }
  0x17   : > { %s1284_s18 = sshll.u32 %s300_s17, 5  ;;  %v1646_v13 = vrot.slane %v364_v12, %v367_v5  ;;  %s1536_s17 = smov 127  }
  0x18   : > { %s303_s21 = scalar_lea.vmem %s1951_s0, %s1284_s18  ;;  %442 = vrot.lane.b32.xlu1 %v395_v11, %s1528_s22  ;;  %s1967_s18 = smov 120  }
  0x19   : > { %v329_v6 = vld [vmem:[%s303_s21] sm:$0xff]  ;;  %v330_v7 = vld [vmem:[%s303_s21 + $0x8] sm:$0xff]  ;;  %v331_v8 = vld [vmem:[%s303_s21 + $0x10] sm:$0xff]  ;;  %vm369_vm8 = vcmp.ne.s16.totalorder %v1646_v13, 0  ;;  %s1542_s22 = smov [#allocation5]  }
  0x1a   : > { %334 = vst.msk [vmem:[#allocation4] sm:$0xff] %vm333_vm2, %v329_v6  ;;  %335 = vst.msk [vmem:[#allocation4 + $0x8] sm:$0xff] %vm333_vm2, %v330_v7  ;;  %v332_v9 = vld [vmem:[%s303_s21 + $0x18] sm:$0xff]  ;;  %s1961_s21 = smov 124  }
  0x1b   : > { %336 = vst.msk [vmem:[#allocation4 + $0x10] sm:$0xff] %vm333_vm2, %v331_v8  ;;  %337 = vst.msk [vmem:[#allocation4 + $0x18] sm:$0xff] %vm333_vm2, %v332_v9 }
  0x1c   : > { %459 = vrot.lane.b32.xlu1 %v1646_v13, %s1960_s23 }
  0x20   : > { %413 = vrot.lane.b32.xlu1 %v1646_v13, %s1531_s25  ;;  %s1467_s25 = sshll.u32 %s1542_s22, 4  ;;  %s1468_s25 = int_to_ptr.vmem [resolvable:$false] %s1467_s25 }
  0x21   : > { %v1648_v14 = vld [vmem:[#allocation4] sm:$0xff]  ;;  %v1650_v15 = vld [vmem:[#allocation4 + $0x8] sm:$0xff]  ;;  %s1469_s23 = scalar_lea.vmem %s1468_s25, 1024 }
  0x22   : > { %v1652_v16 = vld [vmem:[#allocation4 + $0x10] sm:$0xff]  ;;  %v342_v17 = vmax.f32 %v1648_v14, 0.0  ;;  %v343_v18 = vmax.f32 %v1650_v15, 0.0  ;;  %v1658_v19 = vld [vmem:[#allocation4 + $0x18] sm:$0xff] }
  0x23   : > { %v344_v20 = vmax.f32 %v1652_v16, 0.0  ;;  %v345_v21 = vmax.f32 %v1658_v19, 0.0 }
  0x24   : > { %v346_v22 = vpack.c.bf16 %v343_v18, %v342_v17 }
  0x25   : > { %v347_v23 = vpack.c.bf16 %v345_v21, %v344_v20 }
  0x26   : > { %350 = vrot.lane.b32.xlu0 %v346_v22, %s1530_s24 }
  0x2a   : > { %352 = vrot.lane.b32.xlu0 %v347_v23, %s1530_s24 }
  0x2e   : > { %396 = vrot.lane.b32.xlu0 %v395_v11, %s1532_s26  ;;  %s1541_s26 = smov 118  }
  0x32   : > { %488 = vrot.lane.b32.xlu0 %v395_v11, %s1533_s10 }
  0x8a   : > { %v1668_v26 = vpop.permute.xlu1 %442 }
  0x8b   : > { %vm444_vm9 = vcmp.ne.s16.totalorder %v1668_v26, 0 }
  0x8e   : > { %v1682_v32 = vpop.permute.xlu1 %459 }
  0x8f   : > { %vm461_vm10 = vcmp.ne.s16.totalorder %v1682_v32, 0 }
  0x92   : > { %v1702_v38 = vpop.permute.xlu1 %413 }
  0x93   : > { %vm415_vm12 = vcmp.ne.s16.totalorder %v1702_v38, 0  ;;  %v843_v38 = vld [vmem:[%s1955_s4 + $0x8] sm:$0xff] }
  0x98   : > { %v351_v24 = vpop.permute.xlu0 %350 }
  0x99   : > { %357 = vst.msk [vmem:[#allocation2] sm:$0xff] %vm356_vm7, %v351_v24 }
  0x9c   : > { %v353_v25 = vpop.permute.xlu0 %352 }
  0x9d   : > { %358 = vst.msk [vmem:[#allocation2 + $0x8] sm:$0xff] %vm356_vm7, %v353_v25  ;;  %v1444_v25 = vld [vmem:[%s1952_s1] ss:$12 sps:$4 sm:$0xff]  }
  0xa0   : > { %v359_v27 = vld [vmem:[#allocation2] sm:$0xff]  ;;  %v1689_v34 = vpop.permute.xlu0 %396 }
  0xa1   : > { %432 = vrot.lane.b32.xlu1 %v359_v27, %s1534_s12  ;;  %v370_v28 = vsel %vm369_vm8, %v359_v27, 0  ;;  %v445_v30 = vsel %vm444_vm9, %v359_v27, 0  ;;  %v462_v35 = vsel %vm461_vm10, %v359_v27, 0  ;;  %vm398_vm11 = vcmp.ne.s16.totalorder %v1689_v34, 0  ;;  %v842_v34 = vld [vmem:[%s1955_s4] sm:$0xff] }
  0xa2   : > { %372 = vst.msk [vmem:[#allocation3] sm:$0xff] %vm333_vm2, %v370_v28  ;;  %v399_v37 = vsel %vm398_vm11, %v359_v27, 0  ;;  %v416_v41 = vsel %vm415_vm12, %v359_v27, 0 }
  0xa4   : > { %v360_v29 = vld [vmem:[#allocation2 + $0x8] sm:$0xff]  ;;  %v1709_v40 = vpop.permute.xlu0 %488 }
  0xa5   : > { %449 = vrot.lane.b32.xlu1 %v445_v30, %s1535_s13  ;;  %434 = vrot.lane.b32.xlu0 %v360_v29, %s1534_s12  ;;  %v371_v31 = vsel %vm369_vm8, %v360_v29, 0  ;;  %v446_v33 = vsel %vm444_vm9, %v360_v29, 0  ;;  %v463_v36 = vsel %vm461_vm10, %v360_v29, 0  ;;  %v400_v39 = vsel %vm398_vm11, %v360_v29, 0  ;;  %v1451_v30 = vld [vmem:[%s1952_s1 + $0x18] ss:$12 sps:$4 sm:$0xff]  }
  0xa6   : > { %373 = vst.msk [vmem:[#allocation3 + $0x8] sm:$0xff] %vm333_vm2, %v371_v31  ;;  %vm490_vm13 = vcmp.ne.s16.totalorder %v1709_v40, 0  ;;  %v417_v43 = vsel %vm415_vm12, %v360_v29, 0  ;;  %v1085_v40 = vld [vmem:[%s1957_s6 + $0x10] sm:$0xff] }
  0xa7   : > { %v491_v44 = vsel %vm490_vm13, %v359_v27, 0  ;;  %v492_v46 = vsel %vm490_vm13, %v360_v29, 0 }
  0xa9   : > { %451 = vrot.lane.b32.xlu1 %v446_v33, %s1535_s13  ;;  %378 = vrot.lane.b32.xlu0 %v359_v27, %s1536_s17  ;;  %v511_v57 = vld [vmem:[#allocation3] sm:$0xff] }
  0xad   : > { %466 = vrot.lane.b32.xlu1 %v462_v35, %s1967_s18  ;;  %380 = vrot.lane.b32.xlu0 %v360_v29, %s1536_s17  ;;  %v512_v61 = vld [vmem:[#allocation3 + $0x8] sm:$0xff] }
  0xb1   : > { %468 = vrot.lane.b32.xlu1 %v463_v36, %s1967_s18  ;;  %403 = vrot.lane.b32.xlu0 %v399_v37, %s1965_s19  ;;  %s1285_s18 = sshll.u32 %s1610_s9, 9 }
  0xb2   : > { %s1905_s9 = scalar_lea.hbm %s1959_s8, %s1285_s18 }
  0xb5   : > { %478 = vrot.lane.b32.xlu1 %v359_v27, %s1963_s20  ;;  %405 = vrot.lane.b32.xlu0 %v400_v39, %s1965_s19  ;;  %v1449_v27 = vld [vmem:[%s1952_s1 + $0x1c] ss:$12 sps:$4 sm:$0xff]  }
  0xb9   : > { %480 = vrot.lane.b32.xlu1 %v360_v29, %s1963_s20  ;;  %420 = vrot.lane.b32.xlu0 %v416_v41, %s1961_s21  ;;  %v1448_v29 = vld [vmem:[%s1952_s1 + $0x20] ss:$12 sps:$4 sm:$0xff]  }
  0xbd   : > { %422 = vrot.lane.b32.xlu0 %v417_v43, %s1961_s21  ;;  %495 = vrot.lane.b32.xlu1 %v491_v44, %s1541_s26 }
  0xc1   : > { %497 = vrot.lane.b32.xlu0 %v492_v46, %s1541_s26  ;;  %535 = vperm.xlu1 %1442, %v529_v47  }
  0xc5   : > { %540 = vperm.xlu0 %1443, %v530_v48   ;;  %545 = vperm.xlu1 %1442, %v531_v49  }
  0xc9   : > { %550 = vperm.xlu1 %1442, %v532_v50  }
 0x113   : > { %v433_v51 = vpop.permute.xlu1 %432 }
 0x114   : > { %438 = vst.msk [vmem:[#allocation3 + $0x40] sm:$0xff] %vm333_vm2, %v433_v51 }
 0x117   : > { %v450_v52 = vpop.permute.xlu1 %449  ;;  %v435_v53 = vpop.permute.xlu0 %434 }
 0x118   : > { %455 = vst.msk [vmem:[#allocation3 + $0x50] sm:$0xff] %vm333_vm2, %v450_v52  ;;  %439 = vst.msk [vmem:[#allocation3 + $0x48] sm:$0xff] %vm333_vm2, %v435_v53 }
 0x11b   : > { %v452_v54 = vpop.permute.xlu1 %451  ;;  %v379_v55 = vpop.permute.xlu0 %378  ;;  %v519_v56 = vld [vmem:[#allocation3 + $0x40] sm:$0xff] }
 0x11c   : > { %456 = vst.msk [vmem:[#allocation3 + $0x58] sm:$0xff] %vm333_vm2, %v452_v54  ;;  %384 = vst.msk [vmem:[#allocation3 + $0x10] sm:$0xff] %vm333_vm2, %v379_v55  ;;  %1286 = vmatprep.subr.bf16.mxu0 %v519_v56 }
 0x11d   : > { %1287 = vmatpush3.bf16.msra.mxu0 %v511_v57 }
 0x11f   : > { %v467_v58 = vpop.permute.xlu1 %466  ;;  %v381_v59 = vpop.permute.xlu0 %380  ;;  %v520_v60 = vld [vmem:[#allocation3 + $0x48] sm:$0xff]  ;;  %v521_v62 = vld [vmem:[#allocation3 + $0x50] sm:$0xff] }
 0x120   : > { %472 = vst.msk [vmem:[#allocation3 + $0x60] sm:$0xff] %vm333_vm2, %v467_v58  ;;  %385 = vst.msk [vmem:[#allocation3 + $0x18] sm:$0xff] %vm333_vm2, %v381_v59  ;;  %1288 = vmatprep.subr.bf16.mxu0 %v520_v60 }
 0x121   : > { %1289 = vmatpush3.bf16.msra.mxu0 %v512_v61 }
 0x122   : > { %1290 = vmatprep.subr.bf16.mxu0 %v521_v62 }
 0x123   : > { %v469_v63 = vpop.permute.xlu1 %468  ;;  %v404_v0 = vpop.permute.xlu0 %403  ;;  %v513_v1 = vld [vmem:[#allocation3 + $0x10] sm:$0xff]  ;;  %v522_v2 = vld [vmem:[#allocation3 + $0x58] sm:$0xff] }
 0x124   : > { %473 = vst.msk [vmem:[#allocation3 + $0x68] sm:$0xff] %vm333_vm2, %v469_v63  ;;  %409 = vst.msk [vmem:[#allocation3 + $0x20] sm:$0xff] %vm333_vm2, %v404_v0 }
 0x125   : > { %1291 = vmatpush3.bf16.msra.mxu0 %v513_v1 }
 0x126   : > { %1292 = vmatprep.subr.bf16.mxu0 %v522_v2 }
 0x127   : > { %v479_v3 = vpop.permute.xlu1 %478  ;;  %v406_v4 = vpop.permute.xlu0 %405  ;;  %v514_v5 = vld [vmem:[#allocation3 + $0x18] sm:$0xff]  ;;  %v523_v6 = vld [vmem:[#allocation3 + $0x60] sm:$0xff] }
 0x128   : > { %484 = vst.msk [vmem:[#allocation3 + $0x70] sm:$0xff] %vm333_vm2, %v479_v3  ;;  %410 = vst.msk [vmem:[#allocation3 + $0x28] sm:$0xff] %vm333_vm2, %v406_v4 }
 0x129   : > { %1293 = vmatpush3.bf16.msra.mxu0 %v514_v5 }
 0x12a   : > { %1294 = vmatprep.subr.bf16.mxu0 %v523_v6 }
 0x12b   : > { %v481_v7 = vpop.permute.xlu1 %480  ;;  %v421_v8 = vpop.permute.xlu0 %420  ;;  %v515_v9 = vld [vmem:[#allocation3 + $0x20] sm:$0xff]  ;;  %v524_v10 = vld [vmem:[#allocation3 + $0x68] sm:$0xff] }
 0x12c   : > { %485 = vst.msk [vmem:[#allocation3 + $0x78] sm:$0xff] %vm333_vm2, %v481_v7  ;;  %426 = vst.msk [vmem:[#allocation3 + $0x30] sm:$0xff] %vm333_vm2, %v421_v8 }
 0x12d   : > { %1295 = vmatpush3.bf16.msra.mxu0 %v515_v9 }
 0x12e   : > { %1296 = vmatprep.subr.bf16.mxu0 %v524_v10 }
 0x12f   : > { %v496_v11 = vpop.permute.xlu1 %495  ;;  %v423_v12 = vpop.permute.xlu0 %422  ;;  %v516_v17 = vld [vmem:[#allocation3 + $0x28] sm:$0xff]  ;;  %v525_v18 = vld [vmem:[#allocation3 + $0x70] sm:$0xff] }
 0x130   : > { %501 = vst.msk [vmem:[#allocation3 + $0x80] sm:$0xff] %vm333_vm2, %v496_v11  ;;  %427 = vst.msk [vmem:[#allocation3 + $0x38] sm:$0xff] %vm333_vm2, %v423_v12 }
 0x131   : > { %1297 = vmatpush3.bf16.msra.mxu0 %v516_v17 }
 0x132   : > { %1298 = vmatprep.subr.bf16.mxu0 %v525_v18 }
 0x133   : > { %v498_v20 = vpop.permute.xlu0 %497  ;;  %v517_v21 = vld [vmem:[#allocation3 + $0x30] sm:$0xff]  ;;  %v526_v22 = vld [vmem:[#allocation3 + $0x78] sm:$0xff] }
 0x134   : > { %502 = vst.msk [vmem:[#allocation3 + $0x88] sm:$0xff] %vm333_vm2, %v498_v20 }
 0x135   : > { %1299 = vmatpush3.bf16.msra.mxu0 %v517_v21  ;;  %v1454_v21 = vld [vmem:[%s1954_s3 + $0x4] ss:$12 sps:$4 sm:$0xff]  }
 0x136   : > { %1300 = vmatprep.subr.bf16.mxu0 %v526_v22 }
 0x137   : > { %v527_v23 = vld [vmem:[#allocation3 + $0x80] sm:$0xff]  ;;  %v518_v24 = vld [vmem:[#allocation3 + $0x38] sm:$0xff] }
 0x138   : > { %1357 = vmatprep.subr.bf16.mxu1 %v527_v23 }
 0x139   : > { %1301 = vmatpush3.bf16.msra.mxu0 %v518_v24  ;;  %1358 = vmatpush3.bf16.msra.mxu1 %v527_v23  ;;  %v1455_v23 = vld [vmem:[%s1954_s3 + $0x8] ss:$12 sps:$4 sm:$0xff]  }
 0x13a   : > { %v844_v24 = vld [vmem:[%s1955_s4 + $0x10] sm:$0xff] }
 0x13b   : > { %v528_v28 = vld [vmem:[#allocation3 + $0x88] sm:$0xff] }
 0x13c   : > { %623 = vmatmul.mubr.bf16.vlgmr.msra.gmra.mrb[0].mxu0 %v1444_v25  ;;  %1359 = vmatprep.subr.bf16.mxu1 %v528_v28 }
 0x13d   : > { %1360 = vmatpush3.bf16.msra.mxu1 %v528_v28  ;;  %630 = vmatprep.mubr.bf16.mxu0 %v1449_v27  ;;  %v1083_v27 = vld [vmem:[%s1957_s6] sm:$0xff]  ;;  %v845_v28 = vld [vmem:[%s1955_s4 + $0x18] sm:$0xff] }
 0x140   : > { %1362 = vmatmul.mubr.msk.bf16.vlgmr.msra.gmra.mrb[0].mxu1 %vm583_vm14, %v1448_v29  ;;  %v536_v33 = vpop.permute.xlu1 %535  ;;  %v1084_v29 = vld [vmem:[%s1957_s6 + $0x8] sm:$0xff] }
 0x141   : > { %934 = vmatprep.mubr.bf16.mxu1 %v1454_v21 }
 0x144   : > { %631 = vmatmul.mubr.bf16.gmra.mrb[4].mxu0 %v1451_v30  ;;  %v541_v41 = vpop.permute.xlu0 %540  ;;  %v546_v49 = vpop.permute.xlu1 %545  ;;  %v1086_v30 = vld [vmem:[%s1957_s6 + $0x18] sm:$0xff] }
 0x145   : > { %1369 = vmatprep.mubr.msk.bf16.mxu0 %vm583_vm14, %v1455_v23 }
 0x148   : > { %v551_v62 = vpop.permute.xlu1 %550 }
 0x20f   : > { %v1302_v31 = vpop.f32.mrb[0].mxu0 }
 0x210   : > { %v1303_v35 = vpop.f32.mrb[1].mxu0 }
 0x211   : > { %v1304_v36 = vadd.f32 %v1303_v35, %v1302_v31  ;;  %v1305_v37 = vpop.f32.mrb[2].mxu0 }
 0x212   : > { %v1306_v39 = vpop.f32.mrb[3].mxu0 }
 0x213   : > { %v1307_v42 = vadd.f32 %v1306_v39, %v1305_v37  ;;  %v1363_v43 = vpop.f32.mrb[0].mxu1  ;;  %v625_v44 = vadd.f32 %v1304_v36, %v536_v33 }
 0x214   : > { %v673_v45 = vpop.f32.mrb[1].mxu1 }
 0x215   : > { %v674_v46 = vadd.f32 %v673_v45, %v625_v44  ;;  %v628_v47 = vadd.f32 %v1307_v42, %v541_v41  ;;  %v1364_v48 = vpop.f32.mrb[2].mxu1 }
 0x216   : > { %v676_v50 = vpop.f32.mrb[3].mxu1 }
 0x217   : > { %v677_v51 = vadd.f32 %v676_v50, %v628_v47  ;;  %v1308_v52 = vpop.f32.mrb[4].mxu0  ;;  %v688_v54 = vmax.f32 %v674_v46, 0.0 }
 0x218   : > { %v1309_v53 = vpop.f32.mrb[5].mxu0 }
 0x219   : > { %v689_v55 = vmax.f32 %v677_v51, 0.0  ;;  %v1310_v56 = vadd.f32 %v1309_v53, %v1308_v52  ;;  %v1311_v57 = vpop.f32.mrb[6].mxu0 }
 0x21a   : > { %v1312_v58 = vpop.f32.mrb[7].mxu0 }
 0x21b   : > { %v692_v59 = vpack.c.bf16 %v689_v55, %v688_v54  ;;  %v633_v60 = vadd.f32 %v1310_v56, %v546_v49  ;;  %v1313_v61 = vadd.f32 %v1312_v58, %v1311_v57 }
 0x21d   : > { %v682_v63 = vadd.f32 %v1363_v43, %v633_v60  ;;  %v636_v0 = vadd.f32 %v1313_v61, %v551_v62  ;;  %696 = vrot.lane.b32.xlu0 %v692_v59, %s1530_s24 }
 0x21f   : > { %v685_v1 = vadd.f32 %v1364_v48, %v636_v0  ;;  %v690_v2 = vmax.f32 %v682_v63, 0.0 }
 0x221   : > { %v691_v3 = vmax.f32 %v685_v1, 0.0 }
 0x223   : > { %v693_v4 = vpack.c.bf16 %v691_v3, %v690_v2 }
 0x225   : > { %698 = vrot.lane.b32.xlu1 %v693_v4, %s1530_s24  ;;  %s1971_s24 = smov 120   ;;  %v1452_v4 = vld [vmem:[%s1954_s3] ss:$12 sps:$4 sm:$0xff]  }
 0x28f   : > { %v697_v5 = vpop.permute.xlu0 %696 }
 0x290   : > { %702 = vst.msk [vmem:[#allocation2] sm:$0xff] %vm356_vm7, %v697_v5  ;;  %v1457_v5 = vld [vmem:[%s1954_s3 + $0x1c] ss:$12 sps:$4 sm:$0xff]  }
 0x297   : > { %v699_v6 = vpop.permute.xlu1 %698  ;;  %v750_v7 = vld [vmem:[#allocation2] sm:$0xff] }
 0x298   : > { %703 = vst.msk [vmem:[#allocation2 + $0x8] sm:$0xff] %vm356_vm7, %v699_v6  ;;  %754 = vrot.lane.b32.xlu0 %v750_v7, %s1534_s12  ;;  %v706_v8 = vsel %vm369_vm8, %v750_v7, 0  ;;  %v764_v9 = vsel %vm444_vm9, %v750_v7, 0  ;;  %v778_v17 = vsel %vm461_vm10, %v750_v7, 0  ;;  %v724_v13 = vsel %vm398_vm11, %v750_v7, 0 }
 0x299   : > { %708 = vst.msk [vmem:[#allocation3] sm:$0xff] %vm333_vm2, %v706_v8  ;;  %v738_v32 = vsel %vm415_vm12, %v750_v7, 0  ;;  %v804_v20 = vsel %vm490_vm13, %v750_v7, 0  ;;  %v1459_v8 = vld [vmem:[%s1954_s3 + $0x18] ss:$12 sps:$4 sm:$0xff]  }
 0x29c   : > { %768 = vrot.lane.b32.xlu0 %v764_v9, %s1535_s13  ;;  %v1460_v9 = vld [vmem:[%s1956_s5] sm:$0xff]  }
 0x29f   : > { %v751_v10 = vld [vmem:[#allocation2 + $0x8] sm:$0xff] }
 0x2a0   : > { %756 = vrot.lane.b32.xlu1 %v751_v10, %s1534_s12  ;;  %v765_v11 = vsel %vm444_vm9, %v751_v10, 0  ;;  %v707_v12 = vsel %vm369_vm8, %v751_v10, 0  ;;  %v779_v26 = vsel %vm461_vm10, %v751_v10, 0  ;;  %s1972_s12 = smov 126   ;;  %v725_v18 = vsel %vm398_vm11, %v751_v10, 0  ;;  %v824_v39 = vld [vmem:[#allocation3] sm:$0xff] }
 0x2a1   : > { %770 = vrot.lane.b32.xlu0 %v765_v11, %s1535_s13  ;;  %709 = vst.msk [vmem:[#allocation3 + $0x8] sm:$0xff] %vm333_vm2, %v707_v12  ;;  %s1973_s13 = smov 119   ;;  %v739_v22 = vsel %vm415_vm12, %v751_v10, 0  ;;  %v805_v25 = vsel %vm490_vm13, %v751_v10, 0 }
 0x2a4   : > { %714 = vrot.lane.b32.xlu1 %v750_v7, %s1536_s17 }
 0x2a5   : > { %782 = vrot.lane.b32.xlu0 %v778_v17, %s1971_s24 }
 0x2a8   : > { %716 = vrot.lane.b32.xlu1 %v751_v10, %s1536_s17  ;;  %s1974_s17 = smov 124   ;;  %v825_v46 = vld [vmem:[#allocation3 + $0x8] sm:$0xff] }
 0x2a9   : > { %784 = vrot.lane.b32.xlu0 %v779_v26, %s1971_s24  ;;  %s296_s24 = sand.u32 1, %s1517_s28  }
 0x2aa   : > { %s1909_s21 = scalar_lea.sflag [#allocation6], %s296_s24 }
 0x2ac   : > { %728 = vrot.lane.b32.xlu1 %v724_v13, %s1972_s12 }
 0x2ad   : > { %794 = vrot.lane.b32.xlu0 %v750_v7, %s1973_s13  ;;  %v1456_v7 = vld [vmem:[%s1954_s3 + $0x20] ss:$12 sps:$4 sm:$0xff]  }
 0x2b0   : > { %730 = vrot.lane.b32.xlu1 %v725_v18, %s1972_s12  ;;  %s1253_s12 = sshll.u32 %s296_s24, 5 }
 0x2b1   : > { %796 = vrot.lane.b32.xlu0 %v751_v10, %s1973_s13  ;;  %v1462_v10 = vld [vmem:[%s1958_s7] sm:$0xff]   ;;  %s298_s13 = scalar_lea.vmem [#allocation5], %s1253_s12 }
 0x2b4   : > { %742 = vrot.lane.b32.xlu1 %v738_v32, %s1974_s17 }
 0x2b5   : > { %808 = vrot.lane.b32.xlu0 %v804_v20, %s1541_s26 }
 0x2b8   : > { %744 = vrot.lane.b32.xlu1 %v739_v22, %s1974_s17  ;;  %s1187_s17 = sshll.u32 %s298_s13, 4  ;;  %s1899_s17 = int_to_ptr.vmem [resolvable:$true] %s1187_s17 }
 0x2b9   : > { %848 = vperm.xlu0 %1443, %v842_v34   ;;  %p1470_p0 = scmp.lt.s32.totalorder %s1899_s17, %s1468_s25 }
 0x2bc   : > { %810 = vrot.lane.b32.xlu1 %v805_v25, %s1541_s26  ;;  %s1463_s26 = scalar_lea.vmem %s1899_s17, 512 }
 0x2bd   : > { %858 = vperm.xlu0 %1443, %v844_v24   ;;  %p1464_p11 = scmp.ne.s32.totalorder %s1899_s17, %s1463_s26  ;;  %p1471_p1 = scmp.lt.s32.totalorder %s1469_s23, %s1463_s26 }
 0x2bf   : > { %p1465_p12 = pnand %p1464_p11, %p1627_p5  ;;  %p1472_p2 = por %p1471_p1, %p1470_p0 }
 0x2c0   : > { %853 = vperm.xlu1 %1442, %v843_v38  }
 0x2c1   : > { %1089 = vperm.xlu0 %1443, %v1083_v27   ;;  %p1466_p13 = pneg %p1465_p12 }
 0x2c3   : > { %p1473_p3 = pnand %p1472_p2, %p1466_p13 }
 0x2c4   : > { %863 = vperm.xlu1 %1442, %v845_v28  }
 0x2c5   : > { %1099 = vperm.xlu0 %1443, %v1085_v40  }
 0x2c8   : > { %1094 = vperm.xlu1 %1442, %v1084_v29  }
 0x2cc   : > { %1104 = vperm.xlu1 %1442, %v1086_v30  }
 0x30a   : > { %v755_v31 = vpop.permute.xlu0 %754 }
 0x30b   : > { %760 = vst.msk [vmem:[#allocation3 + $0x40] sm:$0xff] %vm333_vm2, %v755_v31 }
 0x30e   : > { %v769_v33 = vpop.permute.xlu0 %768 }
 0x30f   : > { %774 = vst.msk [vmem:[#allocation3 + $0x50] sm:$0xff] %vm333_vm2, %v769_v33 }
 0x312   : > { %v757_v35 = vpop.permute.xlu1 %756  ;;  %v832_v36 = vld [vmem:[#allocation3 + $0x40] sm:$0xff] }
 0x313   : > { %761 = vst.msk [vmem:[#allocation3 + $0x48] sm:$0xff] %vm333_vm2, %v757_v35  ;;  %1318 = vmatprep.subr.bf16.mxu1 %v832_v36  ;;  %v771_v37 = vpop.permute.xlu0 %770 }
 0x314   : > { %775 = vst.msk [vmem:[#allocation3 + $0x58] sm:$0xff] %vm333_vm2, %v771_v37  ;;  %1319 = vmatpush3.bf16.msra.mxu1 %v824_v39 }
 0x316   : > { %v715_v41 = vpop.permute.xlu1 %714  ;;  %v834_v47 = vld [vmem:[#allocation3 + $0x50] sm:$0xff] }
 0x317   : > { %720 = vst.msk [vmem:[#allocation3 + $0x10] sm:$0xff] %vm333_vm2, %v715_v41  ;;  %v783_v42 = vpop.permute.xlu0 %782 }
 0x318   : > { %788 = vst.msk [vmem:[#allocation3 + $0x60] sm:$0xff] %vm333_vm2, %v783_v42 }
 0x31a   : > { %v717_v43 = vpop.permute.xlu1 %716  ;;  %v833_v44 = vld [vmem:[#allocation3 + $0x48] sm:$0xff] }
 0x31b   : > { %721 = vst.msk [vmem:[#allocation3 + $0x18] sm:$0xff] %vm333_vm2, %v717_v43  ;;  %v785_v45 = vpop.permute.xlu0 %784  ;;  %1320 = vmatprep.subr.bf16.mxu1 %v833_v44  ;;  %v835_v51 = vld [vmem:[#allocation3 + $0x58] sm:$0xff] }
 0x31c   : > { %789 = vst.msk [vmem:[#allocation3 + $0x68] sm:$0xff] %vm333_vm2, %v785_v45  ;;  %1321 = vmatpush3.bf16.msra.mxu1 %v825_v46 }
 0x31d   : > { %1322 = vmatprep.subr.bf16.mxu1 %v834_v47 }
 0x31e   : > { %v729_v48 = vpop.permute.xlu1 %728  ;;  %v826_v49 = vld [vmem:[#allocation3 + $0x10] sm:$0xff] }
 0x31f   : > { %734 = vst.msk [vmem:[#allocation3 + $0x20] sm:$0xff] %vm333_vm2, %v729_v48  ;;  %v795_v50 = vpop.permute.xlu0 %794  ;;  %v836_v55 = vld [vmem:[#allocation3 + $0x60] sm:$0xff] }
 0x320   : > { %800 = vst.msk [vmem:[#allocation3 + $0x70] sm:$0xff] %vm333_vm2, %v795_v50  ;;  %1323 = vmatpush3.bf16.msra.mxu1 %v826_v49 }
 0x321   : > { %1324 = vmatprep.subr.bf16.mxu1 %v835_v51 }
 0x322   : > { %v731_v52 = vpop.permute.xlu1 %730  ;;  %v827_v53 = vld [vmem:[#allocation3 + $0x18] sm:$0xff] }
 0x323   : > { %735 = vst.msk [vmem:[#allocation3 + $0x28] sm:$0xff] %vm333_vm2, %v731_v52  ;;  %v797_v54 = vpop.permute.xlu0 %796  ;;  %v837_v59 = vld [vmem:[#allocation3 + $0x68] sm:$0xff] }
 0x324   : > { %801 = vst.msk [vmem:[#allocation3 + $0x78] sm:$0xff] %vm333_vm2, %v797_v54  ;;  %1325 = vmatpush3.bf16.msra.mxu1 %v827_v53 }
 0x325   : > { %1326 = vmatprep.subr.bf16.mxu1 %v836_v55 }
 0x326   : > { %v743_v56 = vpop.permute.xlu1 %742  ;;  %v828_v57 = vld [vmem:[#allocation3 + $0x20] sm:$0xff] }
 0x327   : > { %748 = vst.msk [vmem:[#allocation3 + $0x30] sm:$0xff] %vm333_vm2, %v743_v56  ;;  %v809_v58 = vpop.permute.xlu0 %808  ;;  %v838_v62 = vld [vmem:[#allocation3 + $0x70] sm:$0xff] }
 0x328   : > { %814 = vst.msk [vmem:[#allocation3 + $0x80] sm:$0xff] %vm333_vm2, %v809_v58  ;;  %1327 = vmatpush3.bf16.msra.mxu1 %v828_v57 }
 0x329   : > { %1328 = vmatprep.subr.bf16.mxu1 %v837_v59 }
 0x32a   : > { %v745_v60 = vpop.permute.xlu1 %744  ;;  %v829_v61 = vld [vmem:[#allocation3 + $0x28] sm:$0xff] }
 0x32b   : > { %749 = vst.msk [vmem:[#allocation3 + $0x38] sm:$0xff] %vm333_vm2, %v745_v60  ;;  %v839_v2 = vld [vmem:[#allocation3 + $0x78] sm:$0xff] }
 0x32c   : > { %1329 = vmatpush3.bf16.msra.mxu1 %v829_v61 }
 0x32d   : > { %1330 = vmatprep.subr.bf16.mxu1 %v838_v62 }
 0x32e   : > { %v811_v63 = vpop.permute.xlu1 %810  ;;  %v830_v0 = vld [vmem:[#allocation3 + $0x30] sm:$0xff] }
 0x32f   : > { %815 = vst.msk [vmem:[#allocation3 + $0x88] sm:$0xff] %vm333_vm2, %v811_v63  ;;  %v840_v1 = vld [vmem:[#allocation3 + $0x80] sm:$0xff] }
 0x330   : > { %1331 = vmatpush3.bf16.msra.mxu1 %v830_v0  ;;  %1365 = vmatprep.subr.bf16.mxu0 %v840_v1 }
 0x331   : > { %1332 = vmatprep.subr.bf16.mxu1 %v839_v2  ;;  %1366 = vmatpush3.bf16.msra.mxu0 %v840_v1 }
 0x332   : > { %v831_v3 = vld [vmem:[#allocation3 + $0x38] sm:$0xff] }
 0x334   : > { %1333 = vmatpush3.bf16.msra.mxu1 %v831_v3 }
 0x335   : > { %1381 = vmatprep.subr.bf16.mxu1 %v1462_v10 }
 0x336   : > { %v841_v6 = vld [vmem:[#allocation3 + $0x88] sm:$0xff] }
 0x337   : > { %935 = vmatmul.mubr.bf16.vlgmr.msra.gmra.mrb[4].mxu1 %v1452_v4  ;;  %1367 = vmatprep.subr.bf16.mxu0 %v841_v6 }
 0x338   : > { %1368 = vmatpush3.bf16.msra.mxu0 %v841_v6  ;;  %942 = vmatprep.mubr.bf16.mxu1 %v1457_v5  ;;  %v849_v13 = vpop.permute.xlu0 %848 }
 0x339   : > { %1382 = vmatpush3.bf16.msra.mxu1 %v1462_v10 }
 0x33b   : > { %1370 = vmatmul.mubr.msk.bf16.vlgmr.msra.gmra.mrb[8].mxu0 %vm583_vm14, %v1456_v7 }
 0x33c   : > { %1377 = vmatprep.mubr.msk.bf16.mxu0 %vm583_vm14, %v1460_v9  ;;  %v859_v35 = vpop.permute.xlu0 %858 }
 0x33f   : > { %943 = vmatmul.mubr.bf16.gmra.mrb[8].mxu1 %v1459_v8  ;;  %v854_v34 = vpop.permute.xlu1 %853 }
 0x343   : > { %v864_v42 = vpop.permute.xlu1 %863 }
 0x40a   : > { %v1334_v11 = vpop.f32.mrb[4].mxu1 }
 0x40b   : > { %v1335_v12 = vpop.f32.mrb[5].mxu1 }
 0x40c   : > { %v1336_v17 = vadd.f32 %v1335_v12, %v1334_v11  ;;  %v1337_v26 = vpop.f32.mrb[6].mxu1 }
 0x40d   : > { %v1338_v18 = vpop.f32.mrb[7].mxu1 }
 0x40e   : > { %v1339_v32 = vadd.f32 %v1338_v18, %v1337_v26  ;;  %v1371_v20 = vpop.f32.mrb[8].mxu0  ;;  %v937_v21 = vadd.f32 %v1336_v17, %v849_v13 }
 0x40f   : > { %v985_v22 = vpop.f32.mrb[9].mxu0 }
 0x410   : > { %v986_v23 = vadd.f32 %v985_v22, %v937_v21  ;;  %v1372_v24 = vpop.f32.mrb[10].mxu0  ;;  %v940_v25 = vadd.f32 %v1339_v32, %v854_v34 }
 0x411   : > { %v988_v38 = vpop.f32.mrb[11].mxu0 }
 0x412   : > { %v989_v27 = vadd.f32 %v988_v38, %v940_v25  ;;  %v1340_v28 = vpop.f32.mrb[8].mxu1  ;;  %v1004_v29 = vadd.f32 %v986_v23, %v1648_v14 }
 0x413   : > { %v1341_v40 = vpop.f32.mrb[9].mxu1 }
 0x414   : > { %v1005_v30 = vadd.f32 %v989_v27, %v1650_v15  ;;  %v1342_v31 = vadd.f32 %v1341_v40, %v1340_v28  ;;  %v1343_v33 = vpop.f32.mrb[10].mxu1  ;;  %v1461_v15 = vld [vmem:[%s1956_s5 + $0x8] sm:$0xff]  }
 0x415   : > { %v1344_v36 = vpop.f32.mrb[11].mxu1 }
 0x416   : > { %v945_v37 = vadd.f32 %v1342_v31, %v859_v35  ;;  %v1345_v39 = vadd.f32 %v1344_v36, %v1343_v33  ;;  %v1012_v41 = vpack.c.bf16 %v1005_v30, %v1004_v29 }
 0x418   : > { %v994_v43 = vadd.f32 %v1371_v20, %v945_v37  ;;  %v948_v44 = vadd.f32 %v1345_v39, %v864_v42  ;;  %1373 = vmatprep.subr.bf16.mxu0 %v1012_v41 }
 0x419   : > { %1374 = vmatpush3.bf16.msra.mxu0 %v1012_v41 }
 0x41a   : > { %v997_v45 = vadd.f32 %v1372_v24, %v948_v44  ;;  %v1006_v46 = vadd.f32 %v994_v43, %v1652_v16  ;;  %v1090_v16 = vpop.permute.xlu0 %1089 }
 0x41c   : > { %v1007_v14 = vadd.f32 %v997_v45, %v1658_v19  ;;  %v1095_v19 = vpop.permute.xlu1 %1094 }
 0x41e   : > { %v1013_v47 = vpack.c.bf16 %v1007_v14, %v1006_v46  ;;  %v1100_v54 = vpop.permute.xlu0 %1099 }
 0x420   : > { %1375 = vmatprep.subr.bf16.mxu0 %v1013_v47  ;;  %v1105_v58 = vpop.permute.xlu1 %1104 }
 0x421   : > { %1376 = vmatpush3.bf16.msra.mxu0 %v1013_v47 }
 0x424   : > { %1378 = vmatmul.mubr.msk.bf16.vlgmr.msra.gmra.mrb[12].mxu0 %vm583_vm14, %v1461_v15 }
 0x4f7   : > { %v1379_v48 = vpop.f32.mrb[12].mxu0 }
 0x4f8   : > { %v1064_v49 = vpop.f32.mrb[13].mxu0 }
 0x4f9   : > { %v1380_v50 = vpop.f32.mrb[14].mxu0 }
 0x4fa   : > { %v1080_v51 = vpack.c.bf16 %v1380_v50, %v1379_v48  ;;  %v1067_v52 = vpop.f32.mrb[15].mxu0 }
 0x4fb   : > { %v1079_v53 = vpack.c.bf16 %v1067_v52, %v1064_v49 }
 0x4fd   : > { %1383 = vmatprep.mubr.msk.bf16.mxu1 %vm333_vm2, %v1079_v53 }
 0x4fe   : > { %1384 = vmatmul.mubr.msk.bf16.vlgmr.msra.gmra.mrb[12].mxu1 %vm333_vm2, %v1080_v51 }
 0x5d1   : > { %v1385_v55 = vpop.f32.mrb[12].mxu1 }
 0x5d2   : > { %v1162_v56 = vadd.f32 %v1385_v55, %v1100_v54  ;;  %v1153_v57 = vpop.f32.mrb[13].mxu1 }
 0x5d3   : > { %v1154_v59 = vadd.f32 %v1153_v57, %v1090_v16  ;;  %v1386_v60 = vpop.f32.mrb[14].mxu1 }
 0x5d4   : > { %1171 = vst.msk [vmem:[%s298_s13 + $0x10] sm:$0xff] %vm1168_vm15, %v1162_v56  ;;  %v1165_v61 = vadd.f32 %v1386_v60, %v1105_v58  ;;  %v1156_v62 = vpop.f32.mrb[15].mxu1 }
 0x5d5   : > { %1169 = vst.msk [vmem:[%s298_s13] sm:$0xff] %vm1168_vm15, %v1154_v59  ;;  %v1157_v63 = vadd.f32 %v1156_v62, %v1095_v19 }
 0x5d6   : > { %1172 = vst.msk [vmem:[%s298_s13 + $0x18] sm:$0xff] %vm1168_vm15, %v1165_v61 }
 0x5d7   : > { %1170 = vst.msk [vmem:[%s298_s13 + $0x8] sm:$0xff] %vm1168_vm15, %v1157_v63 }
 0x5d8   : > { %1476 = shalt.err (!%p1473_p3)
}
 0x5d9   : > { %s1477_s10 = scalar_lea.hbm %s1905_s9, 512  ;;  %s1481_s13 = scalar_lea.hbm %s1959_s8, 1024 }
 0x5da   : > { %p1478_p4 = scmp.ne.s32.totalorder %s1905_s9, %s1477_s10  ;;  %p1482_p9 = scmp.lt.u32.totalorder %s1905_s9, %s1959_s8 }
 0x5db   : > { %p1483_p10 = scmp.lt.u32.totalorder %s1481_s13, %s1477_s10  ;;  %p1485_p12 = scmp.lt.u32.totalorder %s1477_s10, %s1905_s9 }
 0x5dc   : > { %p1479_p7 = pnand %p1478_p4, %p1627_p5 }
 0x5dd   : > { %p1484_p11 = por %p1483_p10, %p1482_p9 }
 0x5de   : > { %p1480_p8 = pneg %p1479_p7 }
 0x5df   : > { %p1486_p13 = por %p1485_p12, %p1484_p11 }
 0x5e1   : > { %p1487_p0 = pnand %p1486_p13, %p1480_p8 }
 0x5e3   : > { %1490 = shalt.err (!%p1487_p0)
}
 0x5e4   : > { %s1543_s20 = smov 128   ;;  %s1975_s26 = smov 8  }
 0x5e5   : > { %1387 = dma.vmem_to_hbm [thread:$0]  (%p1627_p5), %s1899_s17, 512, %s1905_s9, %s1909_s21, %s1543_s20, %s1543_s20, %s1975_s26  }
 0x5e6 PF: > { %p1393_p1 = scmp.ge.s32.totalorder %s1525_s30, 2  ;;  %s1202_s22 = sand.u32 1, %s1513_s27  }
 0x5e7   : > { %s1203_s25 = scalar_lea.sflag [#allocation6], %s1202_s22 }
 0x5e8   : > { %p1390_p2 = pnand %p1393_p1, %p1631_p6 }
 0x5ea   : > { %1508 = dma.done.wait (!%p1390_p2), %s1203_s25, 512  }
 0x5eb   : > { %1510 = vsyncadd (!%p1390_p2), %s1203_s25, 4294966784  ;;  %p18_p3 = scmp.ge.s32.totalorder %s1614_s11, 4   ;;  %s1976_s27 = smov %s1517_s28 }
 0x5ec   : > { %s1977_s28 = smov %s1521_s29  ;;  %s1978_s29 = smov %s1625_s14 }
 0x5ed   : > { %s1979_s30 = smov %s1614_s11  ;;  %20 = sbr.rel (!%p18_p3) target bundleno = 3 (0x3), region = 87 }
 0x5f4   :  { %1208 = vsyncpa [#allocation6], 1 }
 0x5f5   :  { %1210 = vsyncpa [#allocation6 + $0x1], 1 }

</bundles_post_ra>
